<compile_context>
chip_gen: v7x
topology: tpu7x:2x2x1
jax: 0.10.0
libtpu: 0.0.40
codegen_flags: <defaults>
</compile_context>

<pallas_src>
import jax
import jax.numpy as jnp
from jax import lax
from jax.experimental import pallas as pl
from jax.experimental.pallas import tpu as pltpu

EPS = 1e-5     # nn.InstanceNorm2d default eps
PAD = 128      # lane padding (halo) on each side of the flattened image


def _make_double_conv_kernel(H, W, Cin, Cout):
    """Fused (conv3x3 -> InstanceNorm -> ReLU) x 2 for one image."""
    HW = H * W
    Cmax = max(Cin, Cout)
    inv_hw = 1.0 / float(HW)
    # flat-index shift for tap t = 3*dy + dx
    offs = [(dy - 1) * W + (dx - 1) for dy in range(3) for dx in range(3)]

    def kernel(x_ref, w1_ref, w2_ref, m_ref, o_ref, xz_ref):
        # x_ref : (1, Cin, HW)       one image, channels-major, flat spatial
        # w1_ref: (9, Cout, Cin)     stage-1 taps (tap index = 3*dy + dx)
        # w2_ref: (9, Cout, Cout)    stage-2 taps
        # m_ref : (9, 1, HW)  f32    per-tap validity mask (0 outside image)
        # o_ref : (1, Cout, HW)
        # xz_ref: (Cmax, HW + 2*PAD) zero-padded halo scratch (VMEM)

        # Zero the halo scratch once per image (pads stay zero for both stages).
        xz_ref[...] = jnp.zeros(xz_ref.shape, jnp.float32)

        def conv3x3(c_in, w_ref):
            # 9 whole-image tap matmuls accumulated into one f32 (Cout, HW) acc.
            acc = jnp.zeros((Cout, HW), jnp.float32)
            for t, s in enumerate(offs):
                patch = xz_ref[0:c_in, PAD + s:PAD + s + HW]   # shifted image
                patch = patch * m_ref[t]                       # kill wrapped cols
                acc = acc + jnp.dot(w_ref[t], patch,
                                    preferred_element_type=jnp.float32)
            return acc

        def inst_norm_relu(y):
            # One-pass stats: biased variance, matching InstanceNorm2d.
            s1 = jnp.sum(y, axis=1, keepdims=True)
            s2 = jnp.sum(y * y, axis=1, keepdims=True)
            mean = s1 * inv_hw
            var = s2 * inv_hw - mean * mean
            yn = (y - mean) * lax.rsqrt(var + EPS)
            return jnp.maximum(yn, 0.0)

        # Stage 1.  (Conv bias omitted: InstanceNorm(affine=False) cancels it.)
        xz_ref[0:Cin, PAD:PAD + HW] = x_ref[0]
        y1 = inst_norm_relu(conv3x3(Cin, w1_ref))

        # Stage 2, fed directly from VMEM (no HBM round trip of y1).
        xz_ref[0:Cout, PAD:PAD + HW] = y1
        y2 = inst_norm_relu(conv3x3(Cout, w2_ref))

        o_ref[0] = y2.astype(o_ref.dtype)

    return kernel


def _tap_masks(H, W):
    """(9, 1, H*W) f32: 1 where the tap (dy, dx) stays inside the image."""
    r = jnp.arange(H * W, dtype=jnp.int32) // W
    c = jnp.arange(H * W, dtype=jnp.int32) % W
    masks = []
    for dy in range(3):
        for dx in range(3):
            oy, ox = dy - 1, dx - 1
            ok = ((r + oy >= 0) & (r + oy < H) &
                  (c + ox >= 0) & (c + ox < W))
            masks.append(ok.astype(jnp.float32))
    return jnp.stack(masks, axis=0).reshape(9, 1, H * W)


def double_conv_forward(x_nchw, params):
    """Matches double_conv(in_ch, out_ch, mode='instance').forward (NCHW in/out)."""
    N, Cin, H, W = x_nchw.shape
    w1 = params["w1_taps"]                      # (9, Cout, Cin)
    w2 = params["w2_taps"]                      # (9, Cout, Cout)
    Cout = w1.shape[1]
    HW = H * W
    Cmax = max(Cin, Cout)

    x_flat = x_nchw.reshape(N, Cin, HW)         # pure reshape; no transpose/pad
    masks = _tap_masks(H, W)

    kernel = _make_double_conv_kernel(H, W, Cin, Cout)
    out_flat = pl.pallas_call(
        kernel,
        out_shape=jax.ShapeDtypeStruct((N, Cout, HW), x_nchw.dtype),
        grid_spec=pltpu.PrefetchScalarGridSpec(
            num_scalar_prefetch=0,
            grid=(N,),
            in_specs=[
                pl.BlockSpec((1, Cin, HW), lambda n: (n, 0, 0)),
                pl.BlockSpec((9, Cout, Cin), lambda n: (0, 0, 0)),
                pl.BlockSpec((9, Cout, Cout), lambda n: (0, 0, 0)),
                pl.BlockSpec((9, 1, HW), lambda n: (0, 0, 0)),
            ],
            out_specs=pl.BlockSpec((1, Cout, HW), lambda n: (n, 0, 0)),
            scratch_shapes=[pltpu.VMEM((Cmax, HW + 2 * PAD), jnp.float32)],
        ),
        compiler_params=pltpu.CompilerParams(
            dimension_semantics=("parallel",)),
    )(x_flat, w1, w2, masks)

    return out_flat.reshape(N, Cout, H, W)


def init_params(key, in_ch, out_ch):
    """Deterministic synthetic parameters (PyTorch Conv2d shapes)."""
    k1, k2, k3, k4 = jax.random.split(key, 4)

    def to_taps(w_oihw):
        # (Cout, Cin, 3, 3) -> (3, 3, Cout, Cin) -> (9, Cout, Cin); tap = 3*dy+dx
        cout, cin = w_oihw.shape[0], w_oihw.shape[1]
        return jnp.transpose(w_oihw, (2, 3, 0, 1)).reshape(9, cout, cin)

    w1 = 0.1 * jax.random.normal(k1, (out_ch, in_ch, 3, 3), jnp.float32)
    w2 = 0.1 * jax.random.normal(k2, (out_ch, out_ch, 3, 3), jnp.float32)
    b1 = 0.1 * jax.random.normal(k3, (out_ch,), jnp.float32)
    b2 = 0.1 * jax.random.normal(k4, (out_ch,), jnp.float32)
    return {
        "w1_taps": to_taps(w1), "w2_taps": to_taps(w2),
        "w1_oihw": w1, "w2_oihw": w2, "b1": b1, "b2": b2,
    }


def _ref_stage(x_nchw, w_oihw, b):
    """Pure-JAX reference for one conv -> InstanceNorm -> ReLU stage (NCHW)."""
    y = lax.conv_general_dilated(
        x_nchw, w_oihw, window_strides=(1, 1), padding=((1, 1), (1, 1)),
        dimension_numbers=("NCHW", "OIHW", "NCHW"))
    y = y + b[None, :, None, None]
    mean = jnp.mean(y, axis=(2, 3), keepdims=True)
    var = jnp.mean((y - mean) ** 2, axis=(2, 3), keepdims=True)
    y = (y - mean) / jnp.sqrt(var + EPS)
    return jnp.maximum(y, 0.0)


def double_conv_reference(x_nchw, params):
    y = _ref_stage(x_nchw, params["w1_oihw"], params["b1"])
    y = _ref_stage(y, params["w2_oihw"], params["b2"])
    return y


if __name__ == "__main__":
    key = jax.random.PRNGKey(0)
    kx, kp = jax.random.split(key)

    N, in_ch, out_ch, H, W = 2, 4, 8, 16, 16
    x = jax.random.normal(kx, (N, in_ch, H, W), jnp.float32)   # NCHW, like PyTorch
    params = init_params(kp, in_ch, out_ch)

    out = jax.block_until_ready(double_conv_forward(x, params))
    assert out.shape == (N, out_ch, H, W), out.shape

    ref = jax.block_until_ready(double_conv_reference(x, params))
    err = float(jnp.max(jnp.abs(out - ref)))
    assert err < 2e-3, err

    print("KERNEL_OK")
</pallas_src>

<mosaic_0001>
module attributes {stable_mosaic.version = 11 : i64} {
  func.func @kernel(%arg0: i32, %arg1: memref<1x4x256xf32, #tpu.memory_space<vmem>>, %arg2: memref<9x8x4xf32, #tpu.memory_space<vmem>>, %arg3: memref<9x8x8xf32, #tpu.memory_space<vmem>>, %arg4: memref<9x1x256xf32, #tpu.memory_space<vmem>>, %arg5: memref<1x8x256xf32, #tpu.memory_space<vmem>>, %arg6: memref<8x512xf32, #tpu.memory_space<vmem>>) attributes {dimension_semantics = [#tpu.dimension_semantics<parallel>], iteration_bounds = array<i64: 2>, scalar_prefetch = 0 : i64, scratch_operands = 1 : i64, tpu.core_type = #tpu.core_type<tc>, window_params = [{transform_indices = @transform_0, window_bounds = array<i64: 1, 4, 256>}, {pipeline_mode = #tpu.pipeline_mode<synchronous>, transform_indices = @transform_1, window_bounds = array<i64: 9, 8, 4>}, {pipeline_mode = #tpu.pipeline_mode<synchronous>, transform_indices = @transform_2, window_bounds = array<i64: 9, 8, 8>}, {pipeline_mode = #tpu.pipeline_mode<synchronous>, transform_indices = @transform_3, window_bounds = array<i64: 9, 1, 256>}, {transform_indices = @transform_4, window_bounds = array<i64: 1, 8, 256>}]} {
    %cst = arith.constant 0.000000e+00 : f32
    %0 = vector.broadcast %cst : f32 to vector<8x512xf32>
    %c0 = arith.constant 0 : index
    %c0_0 = arith.constant 0 : index
    %1 = vector.load %arg6[%c0, %c0_0] : memref<8x512xf32, #tpu.memory_space<vmem>>, vector<8x512xf32>
    tpu.vector_store %arg6[%c0, %c0_0], %0 {strides = array<i32>} : memref<8x512xf32, #tpu.memory_space<vmem>>, vector<8x512xf32>,
    %c0_1 = arith.constant 0 : index
    %c0_2 = arith.constant 0 : index
    %c0_3 = arith.constant 0 : index
    %2 = vector.load %arg1[%c0_1, %c0_2, %c0_3] : memref<1x4x256xf32, #tpu.memory_space<vmem>>, vector<1x4x256xf32>
    %3 = vector.shape_cast %2 : vector<1x4x256xf32> to vector<4x256xf32>
    %c0_4 = arith.constant 0 : index
    %c128 = arith.constant 128 : index
    %4 = vector.load %arg6[%c0_4, %c128] : memref<8x512xf32, #tpu.memory_space<vmem>>, vector<4x256xf32>
    tpu.vector_store %arg6[%c0_4, %c128], %3 {strides = array<i32>} : memref<8x512xf32, #tpu.memory_space<vmem>>, vector<4x256xf32>,
    %cst_5 = arith.constant 0.000000e+00 : f32
    %5 = vector.broadcast %cst_5 : f32 to vector<8x256xf32>
    %c0_6 = arith.constant 0 : index
    %c111 = arith.constant 111 : index
    %6 = vector.load %arg6[%c0_6, %c111] : memref<8x512xf32, #tpu.memory_space<vmem>>, vector<4x256xf32>
    %c0_7 = arith.constant 0 : index
    %c0_8 = arith.constant 0 : index
    %c0_9 = arith.constant 0 : index
    %7 = vector.load %arg4[%c0_7, %c0_8, %c0_9] : memref<9x1x256xf32, #tpu.memory_space<vmem>>, vector<1x1x256xf32>
    %8 = vector.shape_cast %7 : vector<1x1x256xf32> to vector<1x256xf32>
    %9 = vector.broadcast %8 : vector<1x256xf32> to vector<4x256xf32>
    %10 = arith.mulf %6, %9 : vector<4x256xf32>
    %c0_10 = arith.constant 0 : index
    %c0_11 = arith.constant 0 : index
    %c0_12 = arith.constant 0 : index
    %11 = vector.load %arg2[%c0_10, %c0_11, %c0_12] : memref<9x8x4xf32, #tpu.memory_space<vmem>>, vector<1x8x4xf32>
    %12 = vector.shape_cast %11 : vector<1x8x4xf32> to vector<8x4xf32>
    %cst_13 = arith.constant dense<0.000000e+00> : vector<8x256xf32>
    %13 = tpu.matmul %12, %10, %cst_13 {dimension_numbers = #tpu.dot_dimension_numbers<[1], [0], [0], [1], [0, 0, 1, 1], [], []>} : vector<8x4xf32>, vector<4x256xf32>, vector<8x256xf32> -> vector<8x256xf32>
    %14 = arith.addf %5, %13 : vector<8x256xf32>
    %c0_14 = arith.constant 0 : index
    %c112 = arith.constant 112 : index
    %15 = vector.load %arg6[%c0_14, %c112] : memref<8x512xf32, #tpu.memory_space<vmem>>, vector<4x256xf32>
    %c1 = arith.constant 1 : index
    %c0_15 = arith.constant 0 : index
    %c0_16 = arith.constant 0 : index
    %16 = vector.load %arg4[%c1, %c0_15, %c0_16] : memref<9x1x256xf32, #tpu.memory_space<vmem>>, vector<1x1x256xf32>
    %17 = vector.shape_cast %16 : vector<1x1x256xf32> to vector<1x256xf32>
    %18 = vector.broadcast %17 : vector<1x256xf32> to vector<4x256xf32>
    %19 = arith.mulf %15, %18 : vector<4x256xf32>
    %c1_17 = arith.constant 1 : index
    %c0_18 = arith.constant 0 : index
    %c0_19 = arith.constant 0 : index
    %20 = vector.load %arg2[%c1_17, %c0_18, %c0_19] : memref<9x8x4xf32, #tpu.memory_space<vmem>>, vector<1x8x4xf32>
    %21 = vector.shape_cast %20 : vector<1x8x4xf32> to vector<8x4xf32>
    %cst_20 = arith.constant dense<0.000000e+00> : vector<8x256xf32>
    %22 = tpu.matmul %21, %19, %cst_20 {dimension_numbers = #tpu.dot_dimension_numbers<[1], [0], [0], [1], [0, 0, 1, 1], [], []>} : vector<8x4xf32>, vector<4x256xf32>, vector<8x256xf32> -> vector<8x256xf32>
    %23 = arith.addf %14, %22 : vector<8x256xf32>
    %c0_21 = arith.constant 0 : index
    %c113 = arith.constant 113 : index
    %24 = vector.load %arg6[%c0_21, %c113] : memref<8x512xf32, #tpu.memory_space<vmem>>, vector<4x256xf32>
    %c2 = arith.constant 2 : index
    %c0_22 = arith.constant 0 : index
    %c0_23 = arith.constant 0 : index
    %25 = vector.load %arg4[%c2, %c0_22, %c0_23] : memref<9x1x256xf32, #tpu.memory_space<vmem>>, vector<1x1x256xf32>
    %26 = vector.shape_cast %25 : vector<1x1x256xf32> to vector<1x256xf32>
    %27 = vector.broadcast %26 : vector<1x256xf32> to vector<4x256xf32>
    %28 = arith.mulf %24, %27 : vector<4x256xf32>
    %c2_24 = arith.constant 2 : index
    %c0_25 = arith.constant 0 : index
    %c0_26 = arith.constant 0 : index
    %29 = vector.load %arg2[%c2_24, %c0_25, %c0_26] : memref<9x8x4xf32, #tpu.memory_space<vmem>>, vector<1x8x4xf32>
    %30 = vector.shape_cast %29 : vector<1x8x4xf32> to vector<8x4xf32>
    %cst_27 = arith.constant dense<0.000000e+00> : vector<8x256xf32>
    %31 = tpu.matmul %30, %28, %cst_27 {dimension_numbers = #tpu.dot_dimension_numbers<[1], [0], [0], [1], [0, 0, 1, 1], [], []>} : vector<8x4xf32>, vector<4x256xf32>, vector<8x256xf32> -> vector<8x256xf32>
    %32 = arith.addf %23, %31 : vector<8x256xf32>
    %c0_28 = arith.constant 0 : index
    %c127 = arith.constant 127 : index
    %33 = vector.load %arg6[%c0_28, %c127] : memref<8x512xf32, #tpu.memory_space<vmem>>, vector<4x256xf32>
    %c3 = arith.constant 3 : index
    %c0_29 = arith.constant 0 : index
    %c0_30 = arith.constant 0 : index
    %34 = vector.load %arg4[%c3, %c0_29, %c0_30] : memref<9x1x256xf32, #tpu.memory_space<vmem>>, vector<1x1x256xf32>
    %35 = vector.shape_cast %34 : vector<1x1x256xf32> to vector<1x256xf32>
    %36 = vector.broadcast %35 : vector<1x256xf32> to vector<4x256xf32>
    %37 = arith.mulf %33, %36 : vector<4x256xf32>
    %c3_31 = arith.constant 3 : index
    %c0_32 = arith.constant 0 : index
    %c0_33 = arith.constant 0 : index
    %38 = vector.load %arg2[%c3_31, %c0_32, %c0_33] : memref<9x8x4xf32, #tpu.memory_space<vmem>>, vector<1x8x4xf32>
    %39 = vector.shape_cast %38 : vector<1x8x4xf32> to vector<8x4xf32>
    %cst_34 = arith.constant dense<0.000000e+00> : vector<8x256xf32>
    %40 = tpu.matmul %39, %37, %cst_34 {dimension_numbers = #tpu.dot_dimension_numbers<[1], [0], [0], [1], [0, 0, 1, 1], [], []>} : vector<8x4xf32>, vector<4x256xf32>, vector<8x256xf32> -> vector<8x256xf32>
    %41 = arith.addf %32, %40 : vector<8x256xf32>
    %c0_35 = arith.constant 0 : index
    %c128_36 = arith.constant 128 : index
    %42 = vector.load %arg6[%c0_35, %c128_36] : memref<8x512xf32, #tpu.memory_space<vmem>>, vector<4x256xf32>
    %c4 = arith.constant 4 : index
    %c0_37 = arith.constant 0 : index
    %c0_38 = arith.constant 0 : index
    %43 = vector.load %arg4[%c4, %c0_37, %c0_38] : memref<9x1x256xf32, #tpu.memory_space<vmem>>, vector<1x1x256xf32>
    %44 = vector.shape_cast %43 : vector<1x1x256xf32> to vector<1x256xf32>
    %45 = vector.broadcast %44 : vector<1x256xf32> to vector<4x256xf32>
    %46 = arith.mulf %42, %45 : vector<4x256xf32>
    %c4_39 = arith.constant 4 : index
    %c0_40 = arith.constant 0 : index
    %c0_41 = arith.constant 0 : index
    %47 = vector.load %arg2[%c4_39, %c0_40, %c0_41] : memref<9x8x4xf32, #tpu.memory_space<vmem>>, vector<1x8x4xf32>
    %48 = vector.shape_cast %47 : vector<1x8x4xf32> to vector<8x4xf32>
    %cst_42 = arith.constant dense<0.000000e+00> : vector<8x256xf32>
    %49 = tpu.matmul %48, %46, %cst_42 {dimension_numbers = #tpu.dot_dimension_numbers<[1], [0], [0], [1], [0, 0, 1, 1], [], []>} : vector<8x4xf32>, vector<4x256xf32>, vector<8x256xf32> -> vector<8x256xf32>
    %50 = arith.addf %41, %49 : vector<8x256xf32>
    %c0_43 = arith.constant 0 : index
    %c129 = arith.constant 129 : index
    %51 = vector.load %arg6[%c0_43, %c129] : memref<8x512xf32, #tpu.memory_space<vmem>>, vector<4x256xf32>
    %c5 = arith.constant 5 : index
    %c0_44 = arith.constant 0 : index
    %c0_45 = arith.constant 0 : index
    %52 = vector.load %arg4[%c5, %c0_44, %c0_45] : memref<9x1x256xf32, #tpu.memory_space<vmem>>, vector<1x1x256xf32>
    %53 = vector.shape_cast %52 : vector<1x1x256xf32> to vector<1x256xf32>
    %54 = vector.broadcast %53 : vector<1x256xf32> to vector<4x256xf32>
    %55 = arith.mulf %51, %54 : vector<4x256xf32>
    %c5_46 = arith.constant 5 : index
    %c0_47 = arith.constant 0 : index
    %c0_48 = arith.constant 0 : index
    %56 = vector.load %arg2[%c5_46, %c0_47, %c0_48] : memref<9x8x4xf32, #tpu.memory_space<vmem>>, vector<1x8x4xf32>
    %57 = vector.shape_cast %56 : vector<1x8x4xf32> to vector<8x4xf32>
    %cst_49 = arith.constant dense<0.000000e+00> : vector<8x256xf32>
    %58 = tpu.matmul %57, %55, %cst_49 {dimension_numbers = #tpu.dot_dimension_numbers<[1], [0], [0], [1], [0, 0, 1, 1], [], []>} : vector<8x4xf32>, vector<4x256xf32>, vector<8x256xf32> -> vector<8x256xf32>
    %59 = arith.addf %50, %58 : vector<8x256xf32>
    %c0_50 = arith.constant 0 : index
    %c143 = arith.constant 143 : index
    %60 = vector.load %arg6[%c0_50, %c143] : memref<8x512xf32, #tpu.memory_space<vmem>>, vector<4x256xf32>
    %c6 = arith.constant 6 : index
    %c0_51 = arith.constant 0 : index
    %c0_52 = arith.constant 0 : index
    %61 = vector.load %arg4[%c6, %c0_51, %c0_52] : memref<9x1x256xf32, #tpu.memory_space<vmem>>, vector<1x1x256xf32>
    %62 = vector.shape_cast %61 : vector<1x1x256xf32> to vector<1x256xf32>
    %63 = vector.broadcast %62 : vector<1x256xf32> to vector<4x256xf32>
    %64 = arith.mulf %60, %63 : vector<4x256xf32>
    %c6_53 = arith.constant 6 : index
    %c0_54 = arith.constant 0 : index
    %c0_55 = arith.constant 0 : index
    %65 = vector.load %arg2[%c6_53, %c0_54, %c0_55] : memref<9x8x4xf32, #tpu.memory_space<vmem>>, vector<1x8x4xf32>
    %66 = vector.shape_cast %65 : vector<1x8x4xf32> to vector<8x4xf32>
    %cst_56 = arith.constant dense<0.000000e+00> : vector<8x256xf32>
    %67 = tpu.matmul %66, %64, %cst_56 {dimension_numbers = #tpu.dot_dimension_numbers<[1], [0], [0], [1], [0, 0, 1, 1], [], []>} : vector<8x4xf32>, vector<4x256xf32>, vector<8x256xf32> -> vector<8x256xf32>
    %68 = arith.addf %59, %67 : vector<8x256xf32>
    %c0_57 = arith.constant 0 : index
    %c144 = arith.constant 144 : index
    %69 = vector.load %arg6[%c0_57, %c144] : memref<8x512xf32, #tpu.memory_space<vmem>>, vector<4x256xf32>
    %c7 = arith.constant 7 : index
    %c0_58 = arith.constant 0 : index
    %c0_59 = arith.constant 0 : index
    %70 = vector.load %arg4[%c7, %c0_58, %c0_59] : memref<9x1x256xf32, #tpu.memory_space<vmem>>, vector<1x1x256xf32>
    %71 = vector.shape_cast %70 : vector<1x1x256xf32> to vector<1x256xf32>
    %72 = vector.broadcast %71 : vector<1x256xf32> to vector<4x256xf32>
    %73 = arith.mulf %69, %72 : vector<4x256xf32>
    %c7_60 = arith.constant 7 : index
    %c0_61 = arith.constant 0 : index
    %c0_62 = arith.constant 0 : index
    %74 = vector.load %arg2[%c7_60, %c0_61, %c0_62] : memref<9x8x4xf32, #tpu.memory_space<vmem>>, vector<1x8x4xf32>
    %75 = vector.shape_cast %74 : vector<1x8x4xf32> to vector<8x4xf32>
    %cst_63 = arith.constant dense<0.000000e+00> : vector<8x256xf32>
    %76 = tpu.matmul %75, %73, %cst_63 {dimension_numbers = #tpu.dot_dimension_numbers<[1], [0], [0], [1], [0, 0, 1, 1], [], []>} : vector<8x4xf32>, vector<4x256xf32>, vector<8x256xf32> -> vector<8x256xf32>
    %77 = arith.addf %68, %76 : vector<8x256xf32>
    %c0_64 = arith.constant 0 : index
    %c145 = arith.constant 145 : index
    %78 = vector.load %arg6[%c0_64, %c145] : memref<8x512xf32, #tpu.memory_space<vmem>>, vector<4x256xf32>
    %c8 = arith.constant 8 : index
    %c0_65 = arith.constant 0 : index
    %c0_66 = arith.constant 0 : index
    %79 = vector.load %arg4[%c8, %c0_65, %c0_66] : memref<9x1x256xf32, #tpu.memory_space<vmem>>, vector<1x1x256xf32>
    %80 = vector.shape_cast %79 : vector<1x1x256xf32> to vector<1x256xf32>
    %81 = vector.broadcast %80 : vector<1x256xf32> to vector<4x256xf32>
    %82 = arith.mulf %78, %81 : vector<4x256xf32>
    %c8_67 = arith.constant 8 : index
    %c0_68 = arith.constant 0 : index
    %c0_69 = arith.constant 0 : index
    %83 = vector.load %arg2[%c8_67, %c0_68, %c0_69] : memref<9x8x4xf32, #tpu.memory_space<vmem>>, vector<1x8x4xf32>
    %84 = vector.shape_cast %83 : vector<1x8x4xf32> to vector<8x4xf32>
    %cst_70 = arith.constant dense<0.000000e+00> : vector<8x256xf32>
    %85 = tpu.matmul %84, %82, %cst_70 {dimension_numbers = #tpu.dot_dimension_numbers<[1], [0], [0], [1], [0, 0, 1, 1], [], []>} : vector<8x4xf32>, vector<4x256xf32>, vector<8x256xf32> -> vector<8x256xf32>
    %86 = arith.addf %77, %85 : vector<8x256xf32>
    %cst_71 = arith.constant dense<0.000000e+00> : vector<8xf32>
    %87 = vector.multi_reduction <add>, %86, %cst_71 [1] : vector<8x256xf32> to vector<8xf32>
    %88 = vector.shape_cast %87 : vector<8xf32> to vector<8x1xf32>
    %89 = arith.mulf %86, %86 : vector<8x256xf32>
    %cst_72 = arith.constant dense<0.000000e+00> : vector<8xf32>
    %90 = vector.multi_reduction <add>, %89, %cst_72 [1] : vector<8x256xf32> to vector<8xf32>
    %91 = vector.shape_cast %90 : vector<8xf32> to vector<8x1xf32>
    %cst_73 = arith.constant 3.906250e-03 : f32
    %92 = vector.broadcast %cst_73 : f32 to vector<8x1xf32>
    %93 = arith.mulf %88, %92 : vector<8x1xf32>
    %cst_74 = arith.constant 3.906250e-03 : f32
    %94 = vector.broadcast %cst_74 : f32 to vector<8x1xf32>
    %95 = arith.mulf %91, %94 : vector<8x1xf32>
    %96 = arith.mulf %93, %93 : vector<8x1xf32>
    %97 = arith.subf %95, %96 : vector<8x1xf32>
    %98 = vector.broadcast %93 : vector<8x1xf32> to vector<8x256xf32>
    %99 = arith.subf %86, %98 : vector<8x256xf32>
    %cst_75 = arith.constant 9.99999974E-6 : f32
    %100 = vector.broadcast %cst_75 : f32 to vector<8x1xf32>
    %101 = arith.addf %97, %100 : vector<8x1xf32>
    %102 = math.rsqrt %101 : vector<8x1xf32>
    %103 = vector.broadcast %102 : vector<8x1xf32> to vector<8x256xf32>
    %104 = arith.mulf %99, %103 : vector<8x256xf32>
    %cst_76 = arith.constant 0.000000e+00 : f32
    %105 = vector.broadcast %cst_76 : f32 to vector<8x256xf32>
    %106 = arith.maximumf %104, %105 : vector<8x256xf32>
    %c0_77 = arith.constant 0 : index
    %c128_78 = arith.constant 128 : index
    %107 = vector.load %arg6[%c0_77, %c128_78] : memref<8x512xf32, #tpu.memory_space<vmem>>, vector<8x256xf32>
    tpu.vector_store %arg6[%c0_77, %c128_78], %106 {strides = array<i32>} : memref<8x512xf32, #tpu.memory_space<vmem>>, vector<8x256xf32>,
    %cst_79 = arith.constant 0.000000e+00 : f32
    %108 = vector.broadcast %cst_79 : f32 to vector<8x256xf32>
    %c0_80 = arith.constant 0 : index
    %c111_81 = arith.constant 111 : index
    %109 = vector.load %arg6[%c0_80, %c111_81] : memref<8x512xf32, #tpu.memory_space<vmem>>, vector<8x256xf32>
    %c0_82 = arith.constant 0 : index
    %c0_83 = arith.constant 0 : index
    %c0_84 = arith.constant 0 : index
    %110 = vector.load %arg4[%c0_82, %c0_83, %c0_84] : memref<9x1x256xf32, #tpu.memory_space<vmem>>, vector<1x1x256xf32>
    %111 = vector.shape_cast %110 : vector<1x1x256xf32> to vector<1x256xf32>
    %112 = vector.broadcast %111 : vector<1x256xf32> to vector<8x256xf32>
    %113 = arith.mulf %109, %112 : vector<8x256xf32>
    %c0_85 = arith.constant 0 : index
    %c0_86 = arith.constant 0 : index
    %c0_87 = arith.constant 0 : index
    %114 = vector.load %arg3[%c0_85, %c0_86, %c0_87] : memref<9x8x8xf32, #tpu.memory_space<vmem>>, vector<1x8x8xf32>
    %115 = vector.shape_cast %114 : vector<1x8x8xf32> to vector<8x8xf32>
    %cst_88 = arith.constant dense<0.000000e+00> : vector<8x256xf32>
    %116 = tpu.matmul %115, %113, %cst_88 {dimension_numbers = #tpu.dot_dimension_numbers<[1], [0], [0], [1], [0, 0, 1, 1], [], []>} : vector<8x8xf32>, vector<8x256xf32>, vector<8x256xf32> -> vector<8x256xf32>
    %117 = arith.addf %108, %116 : vector<8x256xf32>
    %c0_89 = arith.constant 0 : index
    %c112_90 = arith.constant 112 : index
    %118 = vector.load %arg6[%c0_89, %c112_90] : memref<8x512xf32, #tpu.memory_space<vmem>>, vector<8x256xf32>
    %c1_91 = arith.constant 1 : index
    %c0_92 = arith.constant 0 : index
    %c0_93 = arith.constant 0 : index
    %119 = vector.load %arg4[%c1_91, %c0_92, %c0_93] : memref<9x1x256xf32, #tpu.memory_space<vmem>>, vector<1x1x256xf32>
    %120 = vector.shape_cast %119 : vector<1x1x256xf32> to vector<1x256xf32>
    %121 = vector.broadcast %120 : vector<1x256xf32> to vector<8x256xf32>
    %122 = arith.mulf %118, %121 : vector<8x256xf32>
    %c1_94 = arith.constant 1 : index
    %c0_95 = arith.constant 0 : index
    %c0_96 = arith.constant 0 : index
    %123 = vector.load %arg3[%c1_94, %c0_95, %c0_96] : memref<9x8x8xf32, #tpu.memory_space<vmem>>, vector<1x8x8xf32>
    %124 = vector.shape_cast %123 : vector<1x8x8xf32> to vector<8x8xf32>
    %cst_97 = arith.constant dense<0.000000e+00> : vector<8x256xf32>
    %125 = tpu.matmul %124, %122, %cst_97 {dimension_numbers = #tpu.dot_dimension_numbers<[1], [0], [0], [1], [0, 0, 1, 1], [], []>} : vector<8x8xf32>, vector<8x256xf32>, vector<8x256xf32> -> vector<8x256xf32>
    %126 = arith.addf %117, %125 : vector<8x256xf32>
    %c0_98 = arith.constant 0 : index
    %c113_99 = arith.constant 113 : index
    %127 = vector.load %arg6[%c0_98, %c113_99] : memref<8x512xf32, #tpu.memory_space<vmem>>, vector<8x256xf32>
    %c2_100 = arith.constant 2 : index
    %c0_101 = arith.constant 0 : index
    %c0_102 = arith.constant 0 : index
    %128 = vector.load %arg4[%c2_100, %c0_101, %c0_102] : memref<9x1x256xf32, #tpu.memory_space<vmem>>, vector<1x1x256xf32>
    %129 = vector.shape_cast %128 : vector<1x1x256xf32> to vector<1x256xf32>
    %130 = vector.broadcast %129 : vector<1x256xf32> to vector<8x256xf32>
    %131 = arith.mulf %127, %130 : vector<8x256xf32>
    %c2_103 = arith.constant 2 : index
    %c0_104 = arith.constant 0 : index
    %c0_105 = arith.constant 0 : index
    %132 = vector.load %arg3[%c2_103, %c0_104, %c0_105] : memref<9x8x8xf32, #tpu.memory_space<vmem>>, vector<1x8x8xf32>
    %133 = vector.shape_cast %132 : vector<1x8x8xf32> to vector<8x8xf32>
    %cst_106 = arith.constant dense<0.000000e+00> : vector<8x256xf32>
    %134 = tpu.matmul %133, %131, %cst_106 {dimension_numbers = #tpu.dot_dimension_numbers<[1], [0], [0], [1], [0, 0, 1, 1], [], []>} : vector<8x8xf32>, vector<8x256xf32>, vector<8x256xf32> -> vector<8x256xf32>
    %135 = arith.addf %126, %134 : vector<8x256xf32>
    %c0_107 = arith.constant 0 : index
    %c127_108 = arith.constant 127 : index
    %136 = vector.load %arg6[%c0_107, %c127_108] : memref<8x512xf32, #tpu.memory_space<vmem>>, vector<8x256xf32>
    %c3_109 = arith.constant 3 : index
    %c0_110 = arith.constant 0 : index
    %c0_111 = arith.constant 0 : index
    %137 = vector.load %arg4[%c3_109, %c0_110, %c0_111] : memref<9x1x256xf32, #tpu.memory_space<vmem>>, vector<1x1x256xf32>
    %138 = vector.shape_cast %137 : vector<1x1x256xf32> to vector<1x256xf32>
    %139 = vector.broadcast %138 : vector<1x256xf32> to vector<8x256xf32>
    %140 = arith.mulf %136, %139 : vector<8x256xf32>
    %c3_112 = arith.constant 3 : index
    %c0_113 = arith.constant 0 : index
    %c0_114 = arith.constant 0 : index
    %141 = vector.load %arg3[%c3_112, %c0_113, %c0_114] : memref<9x8x8xf32, #tpu.memory_space<vmem>>, vector<1x8x8xf32>
    %142 = vector.shape_cast %141 : vector<1x8x8xf32> to vector<8x8xf32>
    %cst_115 = arith.constant dense<0.000000e+00> : vector<8x256xf32>
    %143 = tpu.matmul %142, %140, %cst_115 {dimension_numbers = #tpu.dot_dimension_numbers<[1], [0], [0], [1], [0, 0, 1, 1], [], []>} : vector<8x8xf32>, vector<8x256xf32>, vector<8x256xf32> -> vector<8x256xf32>
    %144 = arith.addf %135, %143 : vector<8x256xf32>
    %c0_116 = arith.constant 0 : index
    %c128_117 = arith.constant 128 : index
    %145 = vector.load %arg6[%c0_116, %c128_117] : memref<8x512xf32, #tpu.memory_space<vmem>>, vector<8x256xf32>
    %c4_118 = arith.constant 4 : index
    %c0_119 = arith.constant 0 : index
    %c0_120 = arith.constant 0 : index
    %146 = vector.load %arg4[%c4_118, %c0_119, %c0_120] : memref<9x1x256xf32, #tpu.memory_space<vmem>>, vector<1x1x256xf32>
    %147 = vector.shape_cast %146 : vector<1x1x256xf32> to vector<1x256xf32>
    %148 = vector.broadcast %147 : vector<1x256xf32> to vector<8x256xf32>
    %149 = arith.mulf %145, %148 : vector<8x256xf32>
    %c4_121 = arith.constant 4 : index
    %c0_122 = arith.constant 0 : index
    %c0_123 = arith.constant 0 : index
    %150 = vector.load %arg3[%c4_121, %c0_122, %c0_123] : memref<9x8x8xf32, #tpu.memory_space<vmem>>, vector<1x8x8xf32>
    %151 = vector.shape_cast %150 : vector<1x8x8xf32> to vector<8x8xf32>
    %cst_124 = arith.constant dense<0.000000e+00> : vector<8x256xf32>
    %152 = tpu.matmul %151, %149, %cst_124 {dimension_numbers = #tpu.dot_dimension_numbers<[1], [0], [0], [1], [0, 0, 1, 1], [], []>} : vector<8x8xf32>, vector<8x256xf32>, vector<8x256xf32> -> vector<8x256xf32>
    %153 = arith.addf %144, %152 : vector<8x256xf32>
    %c0_125 = arith.constant 0 : index
    %c129_126 = arith.constant 129 : index
    %154 = vector.load %arg6[%c0_125, %c129_126] : memref<8x512xf32, #tpu.memory_space<vmem>>, vector<8x256xf32>
    %c5_127 = arith.constant 5 : index
    %c0_128 = arith.constant 0 : index
    %c0_129 = arith.constant 0 : index
    %155 = vector.load %arg4[%c5_127, %c0_128, %c0_129] : memref<9x1x256xf32, #tpu.memory_space<vmem>>, vector<1x1x256xf32>
    %156 = vector.shape_cast %155 : vector<1x1x256xf32> to vector<1x256xf32>
    %157 = vector.broadcast %156 : vector<1x256xf32> to vector<8x256xf32>
    %158 = arith.mulf %154, %157 : vector<8x256xf32>
    %c5_130 = arith.constant 5 : index
    %c0_131 = arith.constant 0 : index
    %c0_132 = arith.constant 0 : index
    %159 = vector.load %arg3[%c5_130, %c0_131, %c0_132] : memref<9x8x8xf32, #tpu.memory_space<vmem>>, vector<1x8x8xf32>
    %160 = vector.shape_cast %159 : vector<1x8x8xf32> to vector<8x8xf32>
    %cst_133 = arith.constant dense<0.000000e+00> : vector<8x256xf32>
    %161 = tpu.matmul %160, %158, %cst_133 {dimension_numbers = #tpu.dot_dimension_numbers<[1], [0], [0], [1], [0, 0, 1, 1], [], []>} : vector<8x8xf32>, vector<8x256xf32>, vector<8x256xf32> -> vector<8x256xf32>
    %162 = arith.addf %153, %161 : vector<8x256xf32>
    %c0_134 = arith.constant 0 : index
    %c143_135 = arith.constant 143 : index
    %163 = vector.load %arg6[%c0_134, %c143_135] : memref<8x512xf32, #tpu.memory_space<vmem>>, vector<8x256xf32>
    %c6_136 = arith.constant 6 : index
    %c0_137 = arith.constant 0 : index
    %c0_138 = arith.constant 0 : index
    %164 = vector.load %arg4[%c6_136, %c0_137, %c0_138] : memref<9x1x256xf32, #tpu.memory_space<vmem>>, vector<1x1x256xf32>
    %165 = vector.shape_cast %164 : vector<1x1x256xf32> to vector<1x256xf32>
    %166 = vector.broadcast %165 : vector<1x256xf32> to vector<8x256xf32>
    %167 = arith.mulf %163, %166 : vector<8x256xf32>
    %c6_139 = arith.constant 6 : index
    %c0_140 = arith.constant 0 : index
    %c0_141 = arith.constant 0 : index
    %168 = vector.load %arg3[%c6_139, %c0_140, %c0_141] : memref<9x8x8xf32, #tpu.memory_space<vmem>>, vector<1x8x8xf32>
    %169 = vector.shape_cast %168 : vector<1x8x8xf32> to vector<8x8xf32>
    %cst_142 = arith.constant dense<0.000000e+00> : vector<8x256xf32>
    %170 = tpu.matmul %169, %167, %cst_142 {dimension_numbers = #tpu.dot_dimension_numbers<[1], [0], [0], [1], [0, 0, 1, 1], [], []>} : vector<8x8xf32>, vector<8x256xf32>, vector<8x256xf32> -> vector<8x256xf32>
    %171 = arith.addf %162, %170 : vector<8x256xf32>
    %c0_143 = arith.constant 0 : index
    %c144_144 = arith.constant 144 : index
    %172 = vector.load %arg6[%c0_143, %c144_144] : memref<8x512xf32, #tpu.memory_space<vmem>>, vector<8x256xf32>
    %c7_145 = arith.constant 7 : index
    %c0_146 = arith.constant 0 : index
    %c0_147 = arith.constant 0 : index
    %173 = vector.load %arg4[%c7_145, %c0_146, %c0_147] : memref<9x1x256xf32, #tpu.memory_space<vmem>>, vector<1x1x256xf32>
    %174 = vector.shape_cast %173 : vector<1x1x256xf32> to vector<1x256xf32>
    %175 = vector.broadcast %174 : vector<1x256xf32> to vector<8x256xf32>
    %176 = arith.mulf %172, %175 : vector<8x256xf32>
    %c7_148 = arith.constant 7 : index
    %c0_149 = arith.constant 0 : index
    %c0_150 = arith.constant 0 : index
    %177 = vector.load %arg3[%c7_148, %c0_149, %c0_150] : memref<9x8x8xf32, #tpu.memory_space<vmem>>, vector<1x8x8xf32>
    %178 = vector.shape_cast %177 : vector<1x8x8xf32> to vector<8x8xf32>
    %cst_151 = arith.constant dense<0.000000e+00> : vector<8x256xf32>
    %179 = tpu.matmul %178, %176, %cst_151 {dimension_numbers = #tpu.dot_dimension_numbers<[1], [0], [0], [1], [0, 0, 1, 1], [], []>} : vector<8x8xf32>, vector<8x256xf32>, vector<8x256xf32> -> vector<8x256xf32>
    %180 = arith.addf %171, %179 : vector<8x256xf32>
    %c0_152 = arith.constant 0 : index
    %c145_153 = arith.constant 145 : index
    %181 = vector.load %arg6[%c0_152, %c145_153] : memref<8x512xf32, #tpu.memory_space<vmem>>, vector<8x256xf32>
    %c8_154 = arith.constant 8 : index
    %c0_155 = arith.constant 0 : index
    %c0_156 = arith.constant 0 : index
    %182 = vector.load %arg4[%c8_154, %c0_155, %c0_156] : memref<9x1x256xf32, #tpu.memory_space<vmem>>, vector<1x1x256xf32>
    %183 = vector.shape_cast %182 : vector<1x1x256xf32> to vector<1x256xf32>
    %184 = vector.broadcast %183 : vector<1x256xf32> to vector<8x256xf32>
    %185 = arith.mulf %181, %184 : vector<8x256xf32>
    %c8_157 = arith.constant 8 : index
    %c0_158 = arith.constant 0 : index
    %c0_159 = arith.constant 0 : index
    %186 = vector.load %arg3[%c8_157, %c0_158, %c0_159] : memref<9x8x8xf32, #tpu.memory_space<vmem>>, vector<1x8x8xf32>
    %187 = vector.shape_cast %186 : vector<1x8x8xf32> to vector<8x8xf32>
    %cst_160 = arith.constant dense<0.000000e+00> : vector<8x256xf32>
    %188 = tpu.matmul %187, %185, %cst_160 {dimension_numbers = #tpu.dot_dimension_numbers<[1], [0], [0], [1], [0, 0, 1, 1], [], []>} : vector<8x8xf32>, vector<8x256xf32>, vector<8x256xf32> -> vector<8x256xf32>
    %189 = arith.addf %180, %188 : vector<8x256xf32>
    %cst_161 = arith.constant dense<0.000000e+00> : vector<8xf32>
    %190 = vector.multi_reduction <add>, %189, %cst_161 [1] : vector<8x256xf32> to vector<8xf32>
    %191 = vector.shape_cast %190 : vector<8xf32> to vector<8x1xf32>
    %192 = arith.mulf %189, %189 : vector<8x256xf32>
    %cst_162 = arith.constant dense<0.000000e+00> : vector<8xf32>
    %193 = vector.multi_reduction <add>, %192, %cst_162 [1] : vector<8x256xf32> to vector<8xf32>
    %194 = vector.shape_cast %193 : vector<8xf32> to vector<8x1xf32>
    %cst_163 = arith.constant 3.906250e-03 : f32
    %195 = vector.broadcast %cst_163 : f32 to vector<8x1xf32>
    %196 = arith.mulf %191, %195 : vector<8x1xf32>
    %cst_164 = arith.constant 3.906250e-03 : f32
    %197 = vector.broadcast %cst_164 : f32 to vector<8x1xf32>
    %198 = arith.mulf %194, %197 : vector<8x1xf32>
    %199 = arith.mulf %196, %196 : vector<8x1xf32>
    %200 = arith.subf %198, %199 : vector<8x1xf32>
    %201 = vector.broadcast %196 : vector<8x1xf32> to vector<8x256xf32>
    %202 = arith.subf %189, %201 : vector<8x256xf32>
    %cst_165 = arith.constant 9.99999974E-6 : f32
    %203 = vector.broadcast %cst_165 : f32 to vector<8x1xf32>
    %204 = arith.addf %200, %203 : vector<8x1xf32>
    %205 = math.rsqrt %204 : vector<8x1xf32>
    %206 = vector.broadcast %205 : vector<8x1xf32> to vector<8x256xf32>
    %207 = arith.mulf %202, %206 : vector<8x256xf32>
    %cst_166 = arith.constant 0.000000e+00 : f32
    %208 = vector.broadcast %cst_166 : f32 to vector<8x256xf32>
    %209 = arith.maximumf %207, %208 : vector<8x256xf32>
    %c0_167 = arith.constant 0 : index
    %c0_168 = arith.constant 0 : index
    %c0_169 = arith.constant 0 : index
    %210 = vector.load %arg5[%c0_167, %c0_168, %c0_169] : memref<1x8x256xf32, #tpu.memory_space<vmem>>, vector<1x8x256xf32>
    %211 = vector.shape_cast %210 : vector<1x8x256xf32> to vector<8x256xf32>
    %212 = vector.shape_cast %209 : vector<8x256xf32> to vector<1x8x256xf32>
    tpu.vector_store %arg5[%c0_167, %c0_168, %c0_169], %212 {strides = array<i32>} : memref<1x8x256xf32, #tpu.memory_space<vmem>>, vector<1x8x256xf32>,
    return
  }
  func.func @transform_0(%arg0: i32) -> (i32, i32, i32) {
    %c0_i32 = arith.constant 0 : i32
    %c0_i32_0 = arith.constant 0 : i32
    %c0_i32_1 = arith.constant 0 : i32
    return %arg0, %c0_i32, %c0_i32_0 : i32, i32, i32
  }
  func.func @transform_1(%arg0: i32) -> (i32, i32, i32) {
    %c0_i32 = arith.constant 0 : i32
    %c0_i32_0 = arith.constant 0 : i32
    %c0_i32_1 = arith.constant 0 : i32
    %c0_i32_2 = arith.constant 0 : i32
    return %c0_i32, %c0_i32_0, %c0_i32_1 : i32, i32, i32
  }
  func.func @transform_2(%arg0: i32) -> (i32, i32, i32) {
    %c0_i32 = arith.constant 0 : i32
    %c0_i32_0 = arith.constant 0 : i32
    %c0_i32_1 = arith.constant 0 : i32
    %c0_i32_2 = arith.constant 0 : i32
    return %c0_i32, %c0_i32_0, %c0_i32_1 : i32, i32, i32
  }
  func.func @transform_3(%arg0: i32) -> (i32, i32, i32) {
    %c0_i32 = arith.constant 0 : i32
    %c0_i32_0 = arith.constant 0 : i32
    %c0_i32_1 = arith.constant 0 : i32
    %c0_i32_2 = arith.constant 0 : i32
    return %c0_i32, %c0_i32_0, %c0_i32_1 : i32, i32, i32
  }
  func.func @transform_4(%arg0: i32) -> (i32, i32, i32) {
    %c0_i32 = arith.constant 0 : i32
    %c0_i32_0 = arith.constant 0 : i32
    %c0_i32_1 = arith.constant 0 : i32
    return %arg0, %c0_i32, %c0_i32_0 : i32, i32, i32
  }
}

</mosaic_0001>

<bundles_post_ra>
// kernel: tpu_custom_call.1
= control target key start
LH: loop header
LB: loop body
LE: loop exit
PB: predicated region body
PF: predicated region fallthrough
CT: control target
= control target key end

     0   :  { %9 = vsyncpa [#allocation4], 0  ;;  %s3081_s0 = inlined_call_operand.vmem [shape: f32[2,4,256], index: 0, kind: input, shape index: {}]   ;;  %s3082_s1 = inlined_call_operand.vmem [shape: f32[9,8,4], index: 1, kind: input, shape index: {}]   ;;  %s3083_s2 = inlined_call_operand.vmem [shape: f32[9,8,8], index: 2, kind: input, shape index: {}]   ;;  %s3084_s3 = inlined_call_operand.vmem [shape: f32[9,1,256], index: 3, kind: input, shape index: {}]   ;;  %s3085_s4 = inlined_call_operand.hbm [shape: f32[2,8,256], index: 4, kind: output, shape index: {}]  }
   0x1   :  { %11 = vsyncpa [#allocation4 + $0x1], 0  ;;  %s2609_s15 = smov 0   ;;  %s2611_s16 = smov 0  }
   0x2   :  { %s2613_s17 = smov 0   ;;  %s2615_s18 = smov 0  }
   0x3 LB: > { %s2630_s19 = sadd.s32 4294967295, %s2572_s18   ;;  %s2343_s20 = sadd.s32 4294967294, %s2572_s18   ;;  %s2572_s18 = sphi %s2615_s18, %s3091_s18   ;;  %s2568_s17 = sphi %s2613_s17, %s3090_s17   ;;  %s2564_s16 = sphi %s2611_s16, %s3089_s16   ;;  %s2560_s15 = sphi %s2609_s15, %s3088_s15  }
   0x4   : > { %s2634_s21 = sadd.s32 1, %s2572_s18   ;;  %s113_s22 = sadd.s32 1, %s2568_s17 }
   0x5   : > { %s110_s23 = ssub.s32 %s2572_s18, %s2634_s21  ;;  %p123_p0 = scmp.ne.s32.totalorder %s2568_s17, %s2564_s16 }
   0x6   : > { %p111_p1 = scmp.eq.s32.totalorder %s110_s23, 0  ;;  %p124_p2 = scmp.eq.s32.totalorder %s2630_s19, 1 }
   0x7   : > { %p129_p3 = scmp.ne.s32.totalorder %s2564_s16, %s2560_s15  ;;  %p130_p4 = scmp.eq.s32.totalorder %s2343_s20, 1 }
   0x8   : > { %s2645_s24 = scalar_select %p111_p1, %s2568_s17, %s113_s22  }
   0x9   : > { %p2647_p5 = por %p124_p2, %p123_p0  ;;  %p2651_p6 = por %p130_p4, %p129_p3 }
   0xa   : > { %p2346_p7 = scmp.ge.s32.totalorder %s2572_s18, 1  ;;  %p165_p8 = scmp.lt.s32.totalorder %s2572_s18, 3 }
   0xc   : > { %p166_p9 = pnand %p2346_p7, %p165_p8 }
   0xd   : > { %v211_v0 = vlaneseq (!%p166_p9)  ;;  %v2350_v2 = vld [vmem:[%s3084_s3 + $0x2] sm:$0x3] (!%p166_p9)  ;;  %v209_v3 = vld [vmem:[%s3084_s3] sm:$0x3] (!%p166_p9)  ;;  %v2574_v4 = vmov (!%p166_p9), 0.0   ;;  %p191_p10 = scmp.lt.s32.totalorder (!%p166_p9), %s2630_s19, 1 }
   0xe   : > { %169 = sbr.rel (%p166_p9) target bundleno = 1405 (0x57d), region = 36  ;;  %196 = vst [vmem:[#allocation2] sm:$0xff] (!%p166_p9), %v2574_v4  ;;  %197 = vst [vmem:[#allocation2 + $0x8] sm:$0xff] (!%p166_p9), %v2574_v4  ;;  %342 = vmatprep.mubr.f32.mxu0 (!%p166_p9), %v2574_v4  ;;  %1386 = vmatprep.mubr.f32.mxu1 (!%p166_p9), %v2574_v4  ;;  %s2575_s6 = smov (!%p166_p9), 112   ;;  %v2358_v11 = vld [vmem:[%s3084_s3 + $0x4] sm:$0x3] (!%p166_p9) }
   0xf   : > { %v212_v1 = vshrl.u32 (!%p166_p9), %v211_v0, 7  ;;  %198 = vst [vmem:[#allocation2 + $0x10] sm:$0xff] (!%p166_p9), %v2574_v4  ;;  %199 = vst [vmem:[#allocation2 + $0x18] sm:$0xff] (!%p166_p9), %v2574_v4  ;;  %s2576_s7 = smov (!%p166_p9), 111   ;;  %v2363_v16 = vld [vmem:[%s3084_s3 + $0x6] sm:$0x3] (!%p166_p9) }
  0x10   : > { %s2577_s22 = smov (!%p166_p9), 113   ;;  %v2373_v19 = vld [vmem:[%s3084_s3 + $0xa] sm:$0x3] (!%p166_p9)  ;;  %s2578_s28 = smov (!%p166_p9), 127   ;;  %v2378_v22 = vld [vmem:[%s3084_s3 + $0xc] sm:$0x3] (!%p166_p9) }
  0x11   : > { %v2669_v5 = vsub.s32 (!%p166_p9), 0, %v212_v1  ;;  %v2671_v6 = vsub.s32 (!%p166_p9), 1, %v212_v1  ;;  %v2383_v25 = vld [vmem:[%s3084_s3 + $0xe] sm:$0x3] (!%p166_p9)  ;;  %s2580_s10 = smov (!%p166_p9), 15   ;;  %s2581_s11 = smov (!%p166_p9), 16  }
  0x12   : > { %vm247_vm0 = vcmask (!%p166_p9), 916480   ;;  %v2388_v35 = vld [vmem:[%s3084_s3 + $0x10] sm:$0x3] (!%p166_p9)  ;;  %vm223_vm1 = vcmask (!%p166_p9), 908288   ;;  %vm454_vm2 = vcmask (!%p166_p9), 924672   ;;  %s2582_s14 = smov (!%p166_p9), 17  }
  0x13   : > { %v238_v7 = vrot.slane (!%p166_p9), %v2350_v2, %v2669_v5  ;;  %v214_v8 = vrot.slane (!%p166_p9), %v209_v3, %v2669_v5  ;;  %v242_v9 = vrot.slane (!%p166_p9), %v2350_v2, %v2671_v6  ;;  %v218_v10 = vrot.slane (!%p166_p9), %v209_v3, %v2671_v6  ;;  %s2583_s30 = smov (!%p166_p9), [#allocation3]  }
  0x14   : > { %v445_v14 = vrot.slane (!%p166_p9), %v2358_v11, %v2669_v5  ;;  %v449_v15 = vrot.slane (!%p166_p9), %v2358_v11, %v2671_v6  ;;  %v562_v17 = vrot.slane (!%p166_p9), %v2363_v16, %v2669_v5  ;;  %v566_v18 = vrot.slane (!%p166_p9), %v2363_v16, %v2671_v6 }
  0x15   : > { %s192_s5 = scalar_select %p191_p10, %s2630_s19, 1  ;;  %243 = vrot.lane.b32.xlu0 %v238_v7, %s2575_s6  ;;  %219 = vrot.lane.b32.xlu1 %v214_v8, %s2576_s7  ;;  %v781_v20 = vrot.slane %v2373_v19, %v2669_v5  ;;  %v785_v21 = vrot.slane %v2373_v19, %v2671_v6  ;;  %v896_v23 = vrot.slane %v2378_v22, %v2669_v5  ;;  %v206_v28 = vld [vmem:[#allocation2] sm:$0xf]  ;;  %vm571_vm3 = vcmask 1039360  }
  0x16   : > { %v900_v24 = vrot.slane %v2378_v22, %v2671_v6  ;;  %v1011_v26 = vrot.slane %v2383_v25, %v2669_v5  ;;  %v1015_v27 = vrot.slane %v2383_v25, %v2671_v6  ;;  %v1126_v40 = vrot.slane %v2388_v35, %v2669_v5  ;;  %v774_v62 = vld [vmem:[#allocation2 + $0x18] sm:$0xf] }
  0x17   : > { %s2423_s8 = sshll.u32 %s192_s5, 3  ;;  %s2579_s5 = smov 1   ;;  %v1130_v41 = vrot.slane %v2388_v35, %v2671_v6  ;;  %vm590_vm4 = vcmask 7168   ;;  %vm473_vm5 = vcmask 121856   ;;  %vm266_vm6 = vcmask 130048  }
  0x18   : > { %s195_s13 = scalar_lea.vmem %s3081_s0, %s2423_s8  ;;  %vm273_vm7 = vcmask 1043456   ;;  %vm269_vm8 = vcmask 31744   ;;  %vm358_vm9 = vcmask 138240   ;;  %vm1318_vm10 = vcmask 64512   ;;  %s2514_s8 = sshll.u32 %s2583_s30, 4  ;;  %s2515_s8 = int_to_ptr.vmem [resolvable:$false] %s2514_s8 }
  0x19   : > { %v200_v12 = vld [vmem:[%s195_s13] sm:$0xff]  ;;  %245 = vrot.lane.b32.xlu0 %v242_v9, %s2575_s6  ;;  %221 = vrot.lane.b32.xlu1 %v218_v10, %s2576_s7  ;;  %s2516_s9 = scalar_lea.vmem %s2515_s8, 512 }
  0x1a   : > { %v202_v13 = vcombine.high %v200_v12, %v200_v12  ;;  %204 = vst [vmem:[#allocation2 + $0x8] sm:$0xf] %v200_v12 }
  0x1c   : > { %205 = vst [vmem:[#allocation2 + $0x10] sm:$0xf] %v202_v13 }
  0x1d   : > { %450 = vrot.lane.b32.xlu0 %v445_v14, %s2577_s22  ;;  %452 = vrot.lane.b32.xlu1 %v449_v15, %s2577_s22 }
  0x21   : > { %567 = vrot.lane.b32.xlu0 %v562_v17, %s2578_s28  ;;  %569 = vrot.lane.b32.xlu1 %v566_v18, %s2578_s28  ;;  %v2724_v33 = vld [vmem:[#allocation2 + $0x8] sm:$0xf] }
  0x22   : > { %v772_v2 = vld [vmem:[#allocation2 + $0x8] sm:$0xf] }
  0x23   : > { %v2721_v32 = vld [vmem:[#allocation2 + $0x10] sm:$0xf] }
  0x24   : > { %v773_v59 = vld [vmem:[#allocation2 + $0x10] sm:$0xf] }
  0x25   : > { %786 = vrot.lane.b32.xlu0 %v781_v20, %s2579_s5  ;;  %788 = vrot.lane.b32.xlu1 %v785_v21, %s2579_s5 }
  0x29   : > { %901 = vrot.lane.b32.xlu0 %v896_v23, %s2580_s10  ;;  %903 = vrot.lane.b32.xlu1 %v900_v24, %s2580_s10  ;;  %v2351_v23 = vld [vmem:[%s3082_s1 + $0x8] sm:$0xff] }
  0x2d   : > { %1016 = vrot.lane.b32.xlu0 %v1011_v26, %s2581_s11  ;;  %1018 = vrot.lane.b32.xlu1 %v1015_v27, %s2581_s11 }
  0x87   : > { %v244_v29 = vpop.permute.xlu0 %243  ;;  %v220_v30 = vpop.permute.xlu1 %219 }
  0x88   : > { %v252_v31 = vmul.f32 %v244_v29, %v206_v28  ;;  %v228_v48 = vmul.f32 %v220_v30, %v206_v28 }
  0x8a   : > { %260 = vrot.lane.b32.xlu0 %v252_v31, %s2581_s11 }
  0x8b   : > { %v246_v34 = vpop.permute.xlu0 %245  ;;  %v222_v38 = vpop.permute.xlu1 %221 }
  0x8c   : > { %v248_v36 = vsel %vm247_vm0, %v244_v29, %v246_v34  ;;  %v254_v37 = vmul.f32 %v246_v34, %v2721_v32  ;;  %v224_v42 = vsel %vm223_vm1, %v220_v30, %v222_v38  ;;  %v230_v46 = vmul.f32 %v222_v38, %v2721_v32 }
  0x8d   : > { %v253_v39 = vmul.f32 %v248_v36, %v2724_v33  ;;  %v229_v45 = vmul.f32 %v224_v42, %v2724_v33  ;;  %v231_v36 = vld [vmem:[%s3082_s1] sm:$0xff] }
  0x8e   : > { %264 = vrot.lane.b32.xlu1 %v254_v37, %s2581_s11 }
  0x8f   : > { %262 = vrot.lane.b32.xlu0 %v253_v39, %s2581_s11  ;;  %v451_v43 = vpop.permute.xlu0 %450  ;;  %v453_v44 = vpop.permute.xlu1 %452 }
  0x90   : > { %v455_v47 = vsel %vm454_vm2, %v451_v43, %v453_v44  ;;  %v461_v52 = vmul.f32 %v453_v44, %v2721_v32  ;;  %v459_v53 = vmul.f32 %v451_v43, %v206_v28 }
  0x91   : > { %v460_v49 = vmul.f32 %v455_v47, %v2724_v33 }
  0x92   : > { %1131 = vrot.lane.b32.xlu1 %v1126_v40, %s2582_s14  ;;  %v2368_v40 = vld [vmem:[%s3084_s3 + $0x8] sm:$0x3] }
  0x93   : > { %1133 = vrot.lane.b32.xlu0 %v1130_v41, %s2582_s14  ;;  %v568_v50 = vpop.permute.xlu0 %567  ;;  %v570_v51 = vpop.permute.xlu1 %569  ;;  %v683_v44 = vrot.slane %v2368_v40, %v2671_v6 }
  0x94   : > { %v572_v54 = vsel %vm571_vm3, %v568_v50, %v570_v51  ;;  %v578_v58 = vmul.f32 %v570_v51, %v2721_v32  ;;  %v576_v61 = vmul.f32 %v568_v50, %v206_v28  ;;  %v679_v51 = vrot.slane %v2368_v40, %v2669_v5  ;;  %v2409_v40 = vld [vmem:[%s3084_s3 + $0xc] sm:$0x3] }
  0x95   : > { %v577_v57 = vmul.f32 %v572_v54, %v2724_v33  ;;  %v2364_v54 = vld [vmem:[%s3082_s1 + $0x18] sm:$0xff] }
  0x96   : > { %354 = vrot.lane.b32.xlu1 %v229_v45, %s2582_s14 }
  0x97   : > { %356 = vrot.lane.b32.xlu0 %v230_v46, %s2582_s14  ;;  %v787_v55 = vpop.permute.xlu0 %786  ;;  %v789_v56 = vpop.permute.xlu1 %788  ;;  %v2359_v46 = vld [vmem:[%s3082_s1 + $0x10] sm:$0xff] }
  0x98   : > { %v790_v60 = vsel %vm590_vm4, %v787_v55, %v789_v56  ;;  %v796_v3 = vmul.f32 %v789_v56, %v774_v62  ;;  %v794_v7 = vmul.f32 %v787_v55, %v772_v2  ;;  %v686_v55 = vmul.f32 %v679_v51, %v2724_v33 }
  0x99   : > { %v795_v63 = vmul.f32 %v790_v60, %v773_v59 }
  0x9a   : > { %352 = vrot.lane.b32.xlu1 %v228_v48, %s2582_s14 }
  0x9b   : > { %469 = vrot.lane.b32.xlu0 %v460_v49, %s2580_s10  ;;  %v902_v0 = vpop.permute.xlu0 %901  ;;  %v904_v1 = vpop.permute.xlu1 %903  ;;  %v687_v49 = vmul.f32 %v683_v44, %v2721_v32 }
  0x9c   : > { %v905_v8 = vsel %vm473_vm5, %v902_v0, %v904_v1  ;;  %v911_v12 = vmul.f32 %v904_v1, %v774_v62  ;;  %v909_v14 = vmul.f32 %v902_v0, %v772_v2  ;;  %v2374_v0 = vld [vmem:[%s3082_s1 + $0x28] sm:$0xff] }
  0x9d   : > { %v910_v11 = vmul.f32 %v905_v8, %v773_v59  ;;  %v2379_v8 = vld [vmem:[%s3082_s1 + $0x30] sm:$0xff] }
  0x9e   : > { %471 = vrot.lane.b32.xlu1 %v461_v52, %s2580_s10 }
  0x9f   : > { %467 = vrot.lane.b32.xlu0 %v459_v53, %s2580_s10  ;;  %v1017_v9 = vpop.permute.xlu0 %1016  ;;  %v1019_v10 = vpop.permute.xlu1 %1018 }
  0xa0   : > { %v1020_v13 = vsel %vm266_vm6, %v1017_v9, %v1019_v10  ;;  %v1026_v16 = vmul.f32 %v1019_v10, %v774_v62  ;;  %v1024_v17 = vmul.f32 %v1017_v9, %v772_v2  ;;  %v2384_v10 = vld [vmem:[%s3082_s1 + $0x38] sm:$0xff] }
  0xa1   : > { %v1025_v15 = vmul.f32 %v1020_v13, %v773_v59 }
  0xa2   : > { %586 = vrot.lane.b32.xlu1 %v577_v57, %s2579_s5 }
  0xa3   : > { %588 = vrot.lane.b32.xlu0 %v578_v58, %s2579_s5 }
  0xa6   : > { %584 = vrot.lane.b32.xlu1 %v576_v61, %s2579_s5 }
  0xa7   : > { %804 = vrot.lane.b32.xlu0 %v795_v63, %s2578_s28 }
  0xaa   : > { %806 = vrot.lane.b32.xlu1 %v796_v3, %s2578_s28 }
  0xab   : > { %802 = vrot.lane.b32.xlu0 %v794_v7, %s2578_s28 }
  0xae   : > { %919 = vrot.lane.b32.xlu1 %v910_v11, %s2577_s22 }
  0xaf   : > { %921 = vrot.lane.b32.xlu0 %v911_v12, %s2577_s22 }
  0xb2   : > { %917 = vrot.lane.b32.xlu1 %v909_v14, %s2577_s22 }
  0xb3   : > { %1034 = vrot.lane.b32.xlu0 %v1025_v15, %s2575_s6  ;;  %v2389_v15 = vld [vmem:[%s3082_s1 + $0x40] sm:$0xff] }
  0xb6   : > { %1036 = vrot.lane.b32.xlu1 %v1026_v16, %s2575_s6 }
  0xb7   : > { %1032 = vrot.lane.b32.xlu0 %v1024_v17, %s2575_s6 }
  0xfc   : > { %v261_v18 = vpop.permute.xlu0 %260 }
 0x100   : > { %v265_v19 = vpop.permute.xlu1 %264 }
 0x101   : > { %v263_v20 = vpop.permute.xlu0 %262 }
 0x102   : > { %v268_v21 = vsel %vm266_vm6, %v263_v20, %v265_v19  ;;  %v267_v22 = vsel %vm266_vm6, %v261_v18, %v263_v20 }
 0x103   : > { %2352 = vmatprep.subr.msk.mxu0 %vm273_vm7, %v268_v21 }
 0x104   : > { %2353 = vmatpush1.msk.msra.mxu0 %vm273_vm7, %v267_v22  ;;  %v1132_v24 = vpop.permute.xlu1 %1131 }
 0x105   : > { %v1134_v25 = vpop.permute.xlu0 %1133  ;;  %2354 = vmatmul.mubr.msk.f32.vlgmr.msra.gmra.mrb[0].mxu0 %vm269_vm8, %v2351_v23  ;;  %v1139_v34 = vmul.f32 %v1132_v24, %v772_v2  ;;  %v2393_v23 = vld [vmem:[%s3084_s3 + $0x2] sm:$0x3] }
 0x106   : > { %v1141_v26 = vmul.f32 %v1134_v25, %v774_v62  ;;  %v1135_v27 = vsel %vm358_vm9, %v1132_v24, %v1134_v25  ;;  %432 = vmatprep.mubr.f32.mxu0 %v2574_v4  ;;  %v1291_v24 = vrot.slane %v2393_v23, %v2671_v6  ;;  %v1287_v25 = vrot.slane %v2393_v23, %v2669_v5 }
 0x107   : > { %v1140_v28 = vmul.f32 %v1135_v27, %v773_v59  ;;  %v2369_v59 = vld [vmem:[%s3082_s1 + $0x20] sm:$0xff] }
 0x108   : > { %1151 = vrot.lane.b32.xlu0 %v1141_v26, %s2576_s7  ;;  %v355_v29 = vpop.permute.xlu1 %354  ;;  %v1260_v26 = vld [vmem:[%s3084_s3] sm:$0x3] }
 0x109   : > { %1149 = vrot.lane.b32.xlu1 %v1140_v28, %s2576_s7  ;;  %v357_v30 = vpop.permute.xlu0 %356  ;;  %v1269_v27 = vrot.slane %v1260_v26, %v2671_v6  ;;  %v1265_v28 = vrot.slane %v1260_v26, %v2669_v5 }
 0x10a   : > { %v360_v31 = vsel %vm358_vm9, %v355_v29, %v357_v30 }
 0x10b   : > { %2355 = vmatprep.subr.msk.mxu0 %vm273_vm7, %v360_v31 }
 0x10c   : > { %v353_v35 = vpop.permute.xlu1 %352 }
 0x10d   : > { %1147 = vrot.lane.b32.xlu1 %v1139_v34, %s2576_s7  ;;  %v359_v37 = vsel %vm358_vm9, %v353_v35, %v355_v29  ;;  %v470_v38 = vpop.permute.xlu0 %469  ;;  %v2397_v29 = vld [vmem:[%s3084_s3 + $0x4] sm:$0x3]  ;;  %v2400_v34 = vld [vmem:[%s3084_s3 + $0x6] sm:$0x3] }
 0x10e   : > { %2356 = vmatpush1.msk.msra.mxu0 %vm273_vm7, %v359_v37  ;;  %v1489_v30 = vrot.slane %v2397_v29, %v2671_v6  ;;  %v1485_v31 = vrot.slane %v2397_v29, %v2669_v5  ;;  %v1601_v35 = vrot.slane %v2400_v34, %v2671_v6  ;;  %v2406_v37 = vld [vmem:[%s3084_s3 + $0xa] sm:$0x3] }
 0x10f   : > { %2357 = vmatmul.mubr.msk.f32.vlgmr.msra.gmra.mrb[0].mxu0 %vm269_vm8, %v231_v36  ;;  %v1597_v36 = vrot.slane %v2400_v34, %v2669_v5 }
 0x110   : > { %v472_v39 = vpop.permute.xlu1 %471  ;;  %547 = vmatprep.mubr.f32.mxu0 %v2574_v4 }
 0x111   : > { %v475_v41 = vsel %vm473_vm5, %v470_v38, %v472_v39  ;;  %v468_v42 = vpop.permute.xlu0 %467  ;;  %v1804_v39 = vrot.slane %v2406_v37, %v2669_v5 }
 0x112   : > { %v474_v43 = vsel %vm473_vm5, %v468_v42, %v470_v38  ;;  %2360 = vmatprep.subr.msk.mxu0 %vm273_vm7, %v475_v41  ;;  %v1808_v38 = vrot.slane %v2406_v37, %v2671_v6  ;;  %v1920_v41 = vrot.slane %v2409_v40, %v2671_v6  ;;  %v1916_v42 = vrot.slane %v2409_v40, %v2669_v5 }
 0x113   : > { %2361 = vmatpush1.msk.msra.mxu0 %vm273_vm7, %v474_v43  ;;  %v2412_v43 = vld [vmem:[%s3084_s3 + $0xe] sm:$0x3] }
 0x114   : > { %v587_v45 = vpop.permute.xlu1 %586  ;;  %v2032_v44 = vrot.slane %v2412_v43, %v2671_v6 }
 0x115   : > { %v589_v47 = vpop.permute.xlu0 %588 }
 0x116   : > { %v592_v48 = vsel %vm590_vm4, %v587_v45, %v589_v47 }
 0x117   : > { %2362 = vmatmul.mubr.msk.f32.vlgmr.msra.gmra.mrb[0].mxu0 %vm269_vm8, %v2359_v46  ;;  %2365 = vmatprep.subr.msk.mxu0 %vm273_vm7, %v592_v48 }
 0x118   : > { %v585_v50 = vpop.permute.xlu1 %584  ;;  %664 = vmatprep.mubr.f32.mxu0 %v2574_v4 }
 0x119   : > { %v591_v52 = vsel %vm590_vm4, %v585_v50, %v587_v45  ;;  %v805_v53 = vpop.permute.xlu0 %804  ;;  %v2028_v45 = vrot.slane %v2412_v43, %v2669_v5 }
 0x11a   : > { %2366 = vmatpush1.msk.msra.mxu0 %vm273_vm7, %v591_v52 }
 0x11b   : > { %2370 = vmatprep.subr.msk.mxu0 %vm273_vm7, %v687_v49 }
 0x11c   : > { %v807_v56 = vpop.permute.xlu1 %806 }
 0x11d   : > { %v809_v32 = vsel %vm571_vm3, %v805_v53, %v807_v56  ;;  %v803_v57 = vpop.permute.xlu0 %802 }
 0x11e   : > { %v808_v60 = vsel %vm571_vm3, %v803_v57, %v805_v53 }
 0x11f   : > { %2367 = vmatmul.mubr.msk.f32.vlgmr.msra.gmra.mrb[0].mxu0 %vm269_vm8, %v2364_v54 }
 0x120   : > { %2371 = vmatpush1.msk.msra.mxu0 %vm273_vm7, %v686_v55  ;;  %763 = vmatprep.mubr.f32.mxu0 %v2574_v4  ;;  %v920_v58 = vpop.permute.xlu1 %919 }
 0x121   : > { %2375 = vmatprep.subr.msk.mxu0 %vm273_vm7, %v809_v32  ;;  %v922_v33 = vpop.permute.xlu0 %921 }
 0x122   : > { %v924_v62 = vsel %vm454_vm2, %v920_v58, %v922_v33 }
 0x124   : > { %v918_v61 = vpop.permute.xlu1 %917 }
 0x125   : > { %v1035_v1 = vpop.permute.xlu0 %1034  ;;  %v923_v2 = vsel %vm454_vm2, %v918_v61, %v920_v58 }
 0x127   : > { %2372 = vmatmul.mubr.msk.f32.vlgmr.msra.gmra.mrb[0].mxu0 %vm269_vm8, %v2369_v59 }
 0x128   : > { %2376 = vmatpush1.msk.msra.mxu0 %vm273_vm7, %v808_v60  ;;  %881 = vmatprep.mubr.f32.mxu0 %v2574_v4  ;;  %v1037_v63 = vpop.permute.xlu1 %1036 }
 0x129   : > { %2380 = vmatprep.subr.msk.mxu0 %vm273_vm7, %v924_v62  ;;  %v1039_v3 = vsel %vm247_vm0, %v1035_v1, %v1037_v63  ;;  %v1033_v7 = vpop.permute.xlu0 %1032  ;;  %v2415_v62 = vld [vmem:[%s3084_s3 + $0x10] sm:$0x3] }
 0x12a   : > { %v1038_v9 = vsel %vm247_vm0, %v1033_v7, %v1035_v1  ;;  %v2144_v7 = vrot.slane %v2415_v62, %v2671_v6 }
 0x12f   : > { %2377 = vmatmul.mubr.msk.f32.vlgmr.msra.gmra.mrb[0].mxu0 %vm269_vm8, %v2374_v0 }
 0x130   : > { %2381 = vmatpush1.msk.msra.mxu0 %vm273_vm7, %v923_v2  ;;  %996 = vmatprep.mubr.f32.mxu0 %v2574_v4 }
 0x131   : > { %2385 = vmatprep.subr.msk.mxu0 %vm273_vm7, %v1039_v3  ;;  %v2140_v3 = vrot.slane %v2415_v62, %v2669_v5 }
 0x137   : > { %2382 = vmatmul.mubr.msk.f32.vlgmr.msra.gmra.mrb[0].mxu0 %vm269_vm8, %v2379_v8 }
 0x138   : > { %2386 = vmatpush1.msk.msra.mxu0 %vm273_vm7, %v1038_v9  ;;  %1111 = vmatprep.mubr.f32.mxu0 %v2574_v4 }
 0x13f   : > { %2387 = vmatmul.mubr.msk.f32.vlgmr.msra.gmra.mrb[0].mxu0 %vm269_vm8, %v2384_v10 }
 0x140   : > { %1226 = vmatprep.mubr.f32.mxu0 %v2574_v4 }
 0x17a   : > { %v1152_v11 = vpop.permute.xlu0 %1151 }
 0x17b   : > { %v1150_v12 = vpop.permute.xlu1 %1149 }
 0x17c   : > { %v1154_v13 = vsel %vm223_vm1, %v1150_v12, %v1152_v11 }
 0x17d   : > { %2390 = vmatprep.subr.msk.mxu0 %vm273_vm7, %v1154_v13 }
 0x17f   : > { %v1148_v14 = vpop.permute.xlu1 %1147 }
 0x180   : > { %v1153_v16 = vsel %vm223_vm1, %v1148_v14, %v1150_v12 }
 0x181   : > { %2391 = vmatpush1.msk.msra.mxu0 %vm273_vm7, %v1153_v16 }
 0x182   : > { %2392 = vmatmul.mubr.msk.f32.vlgmr.msra.gmra.mrb[0].mxu0 %vm269_vm8, %v2389_v15 }
 0x255   : > { %v1228_v17 = vpop.f32.mrb[0].mxu0 }
 0x256   : > { %v1230_v18 = vpop.f32.mrb[1].mxu0  ;;  %v1238_v19 = vmul.f32 %v1228_v17, %v1228_v17 }
 0x257   : > { %v1239_v20 = vmul.f32 %v1230_v18, %v1230_v18  ;;  %v1235_v21 = vadd.f32 %v1230_v18, %v1228_v17 }
 0x259   : > { %1236 = vadd.xlane.f32.xlu0 %v1235_v21  ;;  %v1240_v22 = vadd.f32 %v1239_v20, %v1238_v19 }
 0x25b   : > { %1241 = vadd.xlane.f32.xlu1 %v1240_v22 }
 0x26c   : > { %1294 = vrot.lane.b32.xlu1 %v1291_v24, %s2575_s6 }
 0x26f   : > { %1292 = vrot.lane.b32.xlu0 %v1287_v25, %s2575_s6 }
 0x270   : > { %1272 = vrot.lane.b32.xlu1 %v1269_v27, %s2576_s7 }
 0x273   : > { %1270 = vrot.lane.b32.xlu0 %v1265_v28, %s2576_s7 }
 0x274   : > { %1492 = vrot.lane.b32.xlu1 %v1489_v30, %s2577_s22 }
 0x277   : > { %1490 = vrot.lane.b32.xlu0 %v1485_v31, %s2577_s22 }
 0x278   : > { %1604 = vrot.lane.b32.xlu1 %v1601_v35, %s2578_s28 }
 0x27b   : > { %1602 = vrot.lane.b32.xlu0 %v1597_v36, %s2578_s28 }
 0x27c   : > { %1811 = vrot.lane.b32.xlu1 %v1808_v38, %s2579_s5 }
 0x27f   : > { %1809 = vrot.lane.b32.xlu0 %v1804_v39, %s2579_s5 }
 0x280   : > { %1923 = vrot.lane.b32.xlu1 %v1920_v41, %s2580_s10 }
 0x283   : > { %1921 = vrot.lane.b32.xlu0 %v1916_v42, %s2580_s10 }
 0x284   : > { %2035 = vrot.lane.b32.xlu1 %v2032_v44, %s2581_s11 }
 0x287   : > { %2033 = vrot.lane.b32.xlu0 %v2028_v45, %s2581_s11 }
 0x2e6   : > { %v1237_v46 = vpop.xlane.xlu0 %1236 }
 0x2e7   : > { %v1243_v47 = vmul.f32 0.00390625, %v1237_v46 }
 0x2e8   : > { %v1242_v48 = vpop.xlane.xlu1 %1241 }
 0x2e9   : > { %v1244_v49 = vmul.f32 0.00390625, %v1242_v48  ;;  %v1245_v50 = vmul.f32 %v1243_v47, %v1243_v47  ;;  %v1247_v55 = vsub.f32 %v1228_v17, %v1243_v47  ;;  %v1248_v56 = vsub.f32 %v1230_v18, %v1243_v47 }
 0x2ea   : > { %v1293_v51 = vpop.permute.xlu0 %1292 }
 0x2eb   : > { %v1246_v52 = vsub.f32 %v1244_v49, %v1245_v50  ;;  %v1300_v53 = vmul.f32 0.0, %v1293_v51  ;;  %v2394_v49 = vld [vmem:[%s3083_s2 + $0x8] sm:$0xff] }
 0x2ec   : > { %v1295_v32 = vpop.permute.xlu1 %1294 }
 0x2ed   : > { %v1249_v54 = vadd.f32 1e-05, %v1246_v52  ;;  %1308 = vrot.lane.b32.xlu0 %v1300_v53, %s2581_s11  ;;  %v1296_v61 = vsel %vm247_vm0, %v1293_v51, %v1295_v32 }
 0x2ee   : > { %v1271_v2 = vpop.permute.xlu0 %1270 }
 0x2ef   : > { %2506 = vrsqrt.f32 %v1249_v54  ;;  %v1278_v14 = vmul.f32 0.0, %v1271_v2 }
 0x2f0   : > { %v1273_v1 = vpop.permute.xlu1 %1272 }
 0x2f1   : > { %v1274_v8 = vsel %vm223_vm1, %v1271_v2, %v1273_v1 }
 0x2f2   : > { %v1491_v12 = vpop.permute.xlu0 %1490 }
 0x2f3   : > { %v1498_v17 = vmul.f32 0.0, %v1491_v12 }
 0x2f4   : > { %v1493_v9 = vpop.permute.xlu1 %1492 }
 0x2f5   : > { %v1494_v13 = vsel %vm454_vm2, %v1491_v12, %v1493_v9 }
 0x2f6   : > { %v1603_v18 = vpop.permute.xlu0 %1602 }
 0x2f7   : > { %v1610_v26 = vmul.f32 0.0, %v1603_v18 }
 0x2f8   : > { %v1605_v16 = vpop.permute.xlu1 %1604 }
 0x2f9   : > { %v2507_v57 = vpop.eup %2506  ;;  %v1606_v20 = vsel %vm571_vm3, %v1603_v18, %v1605_v16 }
 0x2fa   : > { %v1251_v58 = vmul.f32 %v2507_v57, %v1247_v55  ;;  %v1252_v59 = vmul.f32 %v2507_v57, %v1248_v56  ;;  %v1810_v24 = vpop.permute.xlu0 %1809 }
 0x2fc   : > { %v2907_v60 = vmax.f32 %v1251_v58, 0.0  ;;  %v2909_v33 = vmax.f32 %v1252_v59, 0.0  ;;  %v1812_v21 = vpop.permute.xlu1 %1811 }
 0x2fd   : > { %v1813_v25 = vsel %vm590_vm4, %v1810_v24, %v1812_v21  ;;  %v1819_v29 = vmul.f32 0.0, %v1812_v21 }
 0x2fe   : > { %1255 = vst [vmem:[#allocation2 + $0x8] sm:$0xff] %v2907_v60  ;;  %1256 = vst [vmem:[#allocation2 + $0x10] sm:$0xff] %v2909_v33  ;;  %v1302_v63 = vmul.f32 %v1295_v32, %v2909_v33  ;;  %v1301_v0 = vmul.f32 %v1296_v61, %v2907_v60  ;;  %v1280_v10 = vmul.f32 %v1273_v1, %v2909_v33  ;;  %v1922_v30 = vpop.permute.xlu0 %1921  ;;  %v1281_v61 = vld [vmem:[%s3083_s2] sm:$0xff] }
 0x2ff   : > { %v1279_v11 = vmul.f32 %v1274_v8, %v2907_v60  ;;  %v1499_v15 = vmul.f32 %v1494_v13, %v2907_v60  ;;  %v1500_v19 = vmul.f32 %v1493_v9, %v2909_v33  ;;  %v1612_v22 = vmul.f32 %v1605_v16, %v2909_v33  ;;  %v2398_v9 = vld [vmem:[%s3083_s2 + $0x10] sm:$0xff] }
 0x300   : > { %1312 = vrot.lane.b32.xlu1 %v1302_v63, %s2581_s11  ;;  %1310 = vrot.lane.b32.xlu0 %v1301_v0, %s2581_s11  ;;  %v1611_v23 = vmul.f32 %v1606_v20, %v2907_v60  ;;  %v1818_v27 = vmul.f32 %v1813_v25, %v2909_v33  ;;  %v1924_v28 = vpop.permute.xlu1 %1923  ;;  %v1817_v31 = vmul.f32 %v1810_v24, %v2907_v60  ;;  %v2407_v24 = vld [vmem:[%s3083_s2 + $0x28] sm:$0xff] }
 0x301   : > { %v1925_v34 = vsel %vm473_vm5, %v1922_v30, %v1924_v28  ;;  %v1931_v35 = vmul.f32 0.0, %v1924_v28  ;;  %v1929_v40 = vmul.f32 %v1922_v30, %v2907_v60  ;;  %v2410_v30 = vld [vmem:[%s3083_s2 + $0x30] sm:$0xff] }
 0x302   : > { %v1930_v37 = vmul.f32 %v1925_v34, %v2909_v33  ;;  %v2034_v38 = vpop.permute.xlu0 %2033  ;;  %v2413_v34 = vld [vmem:[%s3083_s2 + $0x38] sm:$0xff] }
 0x303   : > { %v2041_v43 = vmul.f32 %v2034_v38, %v2907_v60 }
 0x304   : > { %2145 = vrot.lane.b32.xlu1 %v2140_v3, %s2582_s14  ;;  %2147 = vrot.lane.b32.xlu0 %v2144_v7, %s2582_s14  ;;  %v2036_v36 = vpop.permute.xlu1 %2035  ;;  %v2403_v3 = vld [vmem:[%s3084_s3 + $0x8] sm:$0x3] }
 0x305   : > { %v2037_v39 = vsel %vm266_vm6, %v2034_v38, %v2036_v36  ;;  %v2043_v42 = vmul.f32 0.0, %v2036_v36  ;;  %v1709_v16 = vrot.slane %v2403_v3, %v2669_v5  ;;  %v2404_v5 = vld [vmem:[%s3083_s2 + $0x20] sm:$0xff] }
 0x306   : > { %v2042_v41 = vmul.f32 %v2037_v39, %v2909_v33  ;;  %v2416_v39 = vld [vmem:[%s3083_s2 + $0x40] sm:$0xff] }
 0x307   : > { %v1716_v18 = vmul.f32 %v1709_v16, %v2907_v60 }
 0x308   : > { %1400 = vrot.lane.b32.xlu0 %v1280_v10, %s2582_s14  ;;  %1398 = vrot.lane.b32.xlu1 %v1279_v11, %s2582_s14  ;;  %v1713_v11 = vrot.slane %v2403_v3, %v2671_v6  ;;  %v2401_v6 = vld [vmem:[%s3083_s2 + $0x18] sm:$0xff] }
 0x30c   : > { %1396 = vrot.lane.b32.xlu1 %v1278_v14, %s2582_s14  ;;  %1508 = vrot.lane.b32.xlu0 %v1499_v15, %s2580_s10  ;;  %v1717_v15 = vmul.f32 %v1713_v11, %v2909_v33 }
 0x310   : > { %1510 = vrot.lane.b32.xlu1 %v1500_v19, %s2580_s10  ;;  %1506 = vrot.lane.b32.xlu0 %v1498_v17, %s2580_s10  ;;  %s2424_s10 = sshll.u32 %s2630_s19, 8 }
 0x311   : > { %s3039_s27 = scalar_lea.hbm %s3085_s4, %s2424_s10 }
 0x314   : > { %1622 = vrot.lane.b32.xlu0 %v1612_v22, %s2579_s5  ;;  %1620 = vrot.lane.b32.xlu1 %v1611_v23, %s2579_s5 }
 0x318   : > { %1618 = vrot.lane.b32.xlu1 %v1610_v26, %s2579_s5  ;;  %1827 = vrot.lane.b32.xlu0 %v1818_v27, %s2578_s28 }
 0x31c   : > { %1829 = vrot.lane.b32.xlu1 %v1819_v29, %s2578_s28  ;;  %1825 = vrot.lane.b32.xlu0 %v1817_v31, %s2578_s28 }
 0x320   : > { %1941 = vrot.lane.b32.xlu0 %v1931_v35, %s2577_s22  ;;  %1939 = vrot.lane.b32.xlu1 %v1930_v37, %s2577_s22 }
 0x324   : > { %1937 = vrot.lane.b32.xlu1 %v1929_v40, %s2577_s22  ;;  %2051 = vrot.lane.b32.xlu0 %v2042_v41, %s2575_s6  ;;  %s188_s22 = sand.u32 1, %s2564_s16  }
 0x325   : > { %s2270_s29 = scalar_lea.sflag [#allocation4], %s188_s22 }
 0x328   : > { %2053 = vrot.lane.b32.xlu1 %v2043_v42, %s2575_s6  ;;  %2049 = vrot.lane.b32.xlu0 %v2041_v43, %s2575_s6 }
 0x35f   : > { %v1309_v44 = vpop.permute.xlu0 %1308 }
 0x372   : > { %v1313_v45 = vpop.permute.xlu1 %1312  ;;  %v1311_v46 = vpop.permute.xlu0 %1310 }
 0x373   : > { %v1315_v47 = vsel %vm266_vm6, %v1311_v46, %v1313_v45  ;;  %v1314_v48 = vsel %vm266_vm6, %v1309_v44, %v1311_v46 }
 0x374   : > { %1322 = vmatprep.subr.mxu1 %v1315_v47 }
 0x375   : > { %1323 = vmatpush1.msra.mxu1 %v1314_v48 }
 0x376   : > { %v2146_v50 = vpop.permute.xlu1 %2145  ;;  %v2148_v51 = vpop.permute.xlu0 %2147  ;;  %2395 = vmatmul.mubr.msk.f32.vlgmr.msra.gmra.mrb[0].mxu1 %vm1318_vm10, %v2394_v49 }
 0x377   : > { %v2149_v52 = vsel %vm358_vm9, %v2146_v50, %v2148_v51  ;;  %v2155_v53 = vmul.f32 0.0, %v2148_v51  ;;  %1473 = vmatprep.mubr.f32.mxu1 %v2574_v4  ;;  %v2153_v57 = vmul.f32 %v2146_v50, %v2907_v60 }
 0x378   : > { %v2154_v54 = vmul.f32 %v2149_v52, %v2909_v33 }
 0x379   : > { %2165 = vrot.lane.b32.xlu0 %v2155_v53, %s2576_s7 }
 0x37a   : > { %v1399_v55 = vpop.permute.xlu1 %1398  ;;  %2163 = vrot.lane.b32.xlu1 %v2154_v54, %s2576_s7  ;;  %v1401_v56 = vpop.permute.xlu0 %1400 }
 0x37b   : > { %v1403_v32 = vsel %vm358_vm9, %v1399_v55, %v1401_v56 }
 0x37c   : > { %1409 = vmatprep.subr.mxu1 %v1403_v32 }
 0x37e   : > { %v1397_v58 = vpop.permute.xlu1 %1396  ;;  %2161 = vrot.lane.b32.xlu1 %v2153_v57, %s2576_s7  ;;  %v1509_v59 = vpop.permute.xlu0 %1508  ;;  %s2347_s7 = sshll.u32 %s188_s22, 4 }
 0x37f   : > { %v1402_v62 = vsel %vm358_vm9, %v1397_v58, %v1399_v55  ;;  %s190_s11 = scalar_lea.vmem [#allocation3], %s2347_s7 }
 0x380   : > { %1410 = vmatpush1.msra.mxu1 %v1402_v62  ;;  %s2284_s14 = sshll.u32 %s190_s11, 4  ;;  %s3041_s14 = int_to_ptr.vmem [resolvable:$true] %s2284_s14 }
 0x381   : > { %2396 = vmatmul.mubr.msk.f32.vlgmr.msra.gmra.mrb[0].mxu1 %vm1318_vm10, %v1281_v61  ;;  %s2510_s19 = scalar_lea.vmem %s3041_s14, 256  ;;  %p2517_p0 = scmp.lt.s32.totalorder %s3041_s14, %s2515_s8 }
 0x382   : > { %v1511_v63 = vpop.permute.xlu1 %1510  ;;  %v1507_v0 = vpop.permute.xlu0 %1506  ;;  %1583 = vmatprep.mubr.f32.mxu1 %v2574_v4  ;;  %p2511_p11 = scmp.ne.s32.totalorder %s3041_s14, %s2510_s19  ;;  %p2518_p1 = scmp.lt.s32.totalorder %s2516_s9, %s2510_s19 }
 0x383   : > { %v1512_v1 = vsel %vm473_vm5, %v1507_v0, %v1509_v59  ;;  %v1513_v2 = vsel %vm473_vm5, %v1509_v59, %v1511_v63 }
 0x384   : > { %1519 = vmatprep.subr.mxu1 %v1513_v2  ;;  %p2512_p12 = pnand %p2511_p11, %p2647_p5  ;;  %p2519_p2 = por %p2518_p1, %p2517_p0 }
 0x385   : > { %1520 = vmatpush1.msra.mxu1 %v1512_v1 }
 0x386   : > { %v1621_v7 = vpop.permute.xlu1 %1620  ;;  %v1623_v8 = vpop.permute.xlu0 %1622  ;;  %p2513_p13 = pneg %p2512_p12 }
 0x387   : > { %v1625_v10 = vsel %vm590_vm4, %v1621_v7, %v1623_v8 }
 0x388   : > { %1631 = vmatprep.subr.mxu1 %v1625_v10  ;;  %p2520_p3 = pnand %p2519_p2, %p2513_p13 }
 0x389   : > { %2399 = vmatmul.mubr.msk.f32.vlgmr.msra.gmra.mrb[0].mxu1 %vm1318_vm10, %v2398_v9 }
 0x38a   : > { %v1619_v12 = vpop.permute.xlu1 %1618  ;;  %1695 = vmatprep.mubr.f32.mxu1 %v2574_v4  ;;  %v1828_v14 = vpop.permute.xlu0 %1827 }
 0x38b   : > { %v1624_v13 = vsel %vm590_vm4, %v1619_v12, %v1621_v7 }
 0x38c   : > { %1632 = vmatpush1.msra.mxu1 %v1624_v13 }
 0x38d   : > { %1723 = vmatprep.subr.mxu1 %v1717_v15 }
 0x38e   : > { %v1830_v17 = vpop.permute.xlu1 %1829  ;;  %v1826_v19 = vpop.permute.xlu0 %1825 }
 0x38f   : > { %v1832_v20 = vsel %vm571_vm3, %v1828_v14, %v1830_v17  ;;  %v1831_v22 = vsel %vm571_vm3, %v1826_v19, %v1828_v14 }
 0x391   : > { %2402 = vmatmul.mubr.msk.f32.vlgmr.msra.gmra.mrb[0].mxu1 %vm1318_vm10, %v2401_v6 }
 0x392   : > { %1724 = vmatpush1.msra.mxu1 %v1716_v18  ;;  %1787 = vmatprep.mubr.f32.mxu1 %v2574_v4  ;;  %v1940_v33 = vpop.permute.xlu1 %1939  ;;  %v1942_v21 = vpop.permute.xlu0 %1941 }
 0x393   : > { %1838 = vmatprep.subr.mxu1 %v1832_v20  ;;  %v1944_v60 = vsel %vm454_vm2, %v1940_v33, %v1942_v21 }
 0x396   : > { %v1938_v23 = vpop.permute.xlu1 %1937  ;;  %v2052_v26 = vpop.permute.xlu0 %2051 }
 0x397   : > { %v1943_v27 = vsel %vm454_vm2, %v1938_v23, %v1940_v33 }
 0x399   : > { %2405 = vmatmul.mubr.msk.f32.vlgmr.msra.gmra.mrb[0].mxu1 %vm1318_vm10, %v2404_v5 }
 0x39a   : > { %1839 = vmatpush1.msra.mxu1 %v1831_v22  ;;  %1902 = vmatprep.mubr.f32.mxu1 %v2574_v4  ;;  %v2054_v25 = vpop.permute.xlu1 %2053  ;;  %v2050_v29 = vpop.permute.xlu0 %2049 }
 0x39b   : > { %1950 = vmatprep.subr.mxu1 %v1944_v60  ;;  %v2056_v28 = vsel %vm247_vm0, %v2052_v26, %v2054_v25  ;;  %v2055_v31 = vsel %vm247_vm0, %v2050_v29, %v2052_v26 }
 0x3a1   : > { %2408 = vmatmul.mubr.msk.f32.vlgmr.msra.gmra.mrb[0].mxu1 %vm1318_vm10, %v2407_v24 }
 0x3a2   : > { %1951 = vmatpush1.msra.mxu1 %v1943_v27  ;;  %2014 = vmatprep.mubr.f32.mxu1 %v2574_v4 }
 0x3a3   : > { %2062 = vmatprep.subr.mxu1 %v2056_v28 }
 0x3a9   : > { %2411 = vmatmul.mubr.msk.f32.vlgmr.msra.gmra.mrb[0].mxu1 %vm1318_vm10, %v2410_v30 }
 0x3aa   : > { %2063 = vmatpush1.msra.mxu1 %v2055_v31  ;;  %2126 = vmatprep.mubr.f32.mxu1 %v2574_v4 }
 0x3b1   : > { %2414 = vmatmul.mubr.msk.f32.vlgmr.msra.gmra.mrb[0].mxu1 %vm1318_vm10, %v2413_v34 }
 0x3b2   : > { %2238 = vmatprep.mubr.f32.mxu1 %v2574_v4 }
 0x3eb   : > { %v2166_v35 = vpop.permute.xlu0 %2165 }
 0x3ec   : > { %v2164_v36 = vpop.permute.xlu1 %2163 }
 0x3ed   : > { %v2168_v37 = vsel %vm223_vm1, %v2164_v36, %v2166_v35 }
 0x3ee   : > { %2174 = vmatprep.subr.mxu1 %v2168_v37 }
 0x3f0   : > { %v2162_v38 = vpop.permute.xlu1 %2161 }
 0x3f1   : > { %v2167_v40 = vsel %vm223_vm1, %v2162_v38, %v2164_v36 }
 0x3f2   : > { %2175 = vmatpush1.msra.mxu1 %v2167_v40 }
 0x3f3   : > { %2417 = vmatmul.mubr.msk.f32.vlgmr.msra.gmra.mrb[0].mxu1 %vm1318_vm10, %v2416_v39 }
 0x4c6   : > { %v2240_v41 = vpop.f32.mrb[0].mxu1 }
 0x4c7   : > { %v2242_v42 = vpop.f32.mrb[1].mxu1  ;;  %v2250_v43 = vmul.f32 %v2240_v41, %v2240_v41 }
 0x4c8   : > { %v2251_v4 = vmul.f32 %v2242_v42, %v2242_v42  ;;  %v2247_v44 = vadd.f32 %v2242_v42, %v2240_v41 }
 0x4ca   : > { %2248 = vadd.xlane.f32.xlu0 %v2247_v44  ;;  %v2252_v45 = vadd.f32 %v2251_v4, %v2250_v43 }
 0x4cc   : > { %2253 = vadd.xlane.f32.xlu1 %v2252_v45 }
 0x557   : > { %v2249_v46 = vpop.xlane.xlu0 %2248 }
 0x558   : > { %v2255_v47 = vmul.f32 0.00390625, %v2249_v46 }
 0x559   : > { %v2254_v48 = vpop.xlane.xlu1 %2253 }
 0x55a   : > { %v2256_v49 = vmul.f32 0.00390625, %v2254_v48  ;;  %v2257_v50 = vmul.f32 %v2255_v47, %v2255_v47  ;;  %v2259_v53 = vsub.f32 %v2240_v41, %v2255_v47  ;;  %v2260_v54 = vsub.f32 %v2242_v42, %v2255_v47 }
 0x55c   : > { %v2258_v51 = vsub.f32 %v2256_v49, %v2257_v50 }
 0x55e   : > { %v2261_v52 = vadd.f32 1e-05, %v2258_v51 }
 0x560   : > { %2508 = vrsqrt.f32 %v2261_v52 }
 0x56a   : > { %v2509_v55 = vpop.eup %2508 }
 0x56b   : > { %v2263_v56 = vmul.f32 %v2509_v55, %v2259_v53  ;;  %v2264_v32 = vmul.f32 %v2509_v55, %v2260_v54 }
 0x56d   : > { %v2265_v57 = vmax.f32 %v2263_v56, 0.0  ;;  %v2266_v58 = vmax.f32 %v2264_v32, 0.0 }
 0x56f   : > { %2267 = vst [vmem:[%s190_s11] sm:$0xff] %v2265_v57  ;;  %2268 = vst [vmem:[%s190_s11 + $0x8] sm:$0xff] %v2266_v58 }
 0x570   : > { %2523 = shalt.err (!%p2520_p3)
}
 0x571   : > { %s2524_s12 = scalar_lea.hbm %s3039_s27, 256  ;;  %s2528_s5 = scalar_lea.hbm %s3085_s4, 512 }
 0x572   : > { %p2525_p4 = scmp.ne.s32.totalorder %s3039_s27, %s2524_s12  ;;  %p2529_p9 = scmp.lt.u32.totalorder %s3039_s27, %s3085_s4 }
 0x573   : > { %p2530_p10 = scmp.lt.u32.totalorder %s2528_s5, %s2524_s12  ;;  %p2532_p12 = scmp.lt.u32.totalorder %s2524_s12, %s3039_s27 }
 0x574   : > { %p2526_p7 = pnand %p2525_p4, %p2647_p5 }
 0x575   : > { %p2531_p11 = por %p2530_p10, %p2529_p9 }
 0x576   : > { %p2527_p8 = pneg %p2526_p7 }
 0x577   : > { %p2533_p13 = por %p2532_p12, %p2531_p11 }
 0x579   : > { %p2534_p0 = pnand %p2533_p13, %p2527_p8 }
 0x57b   : > { %2537 = shalt.err (!%p2534_p0)
}
 0x57c   : > { %2457 = dma.vmem_to_hbm [thread:$0]  (%p2647_p5), %s3041_s14, 256, %s3039_s27, %s2270_s29  }
 0x57d PF: > { %p2463_p1 = scmp.ge.s32.totalorder %s2572_s18, 2  ;;  %s2296_s7 = sand.u32 1, %s2560_s15  }
 0x57e   : > { %s2297_s10 = scalar_lea.sflag [#allocation4], %s2296_s7 }
 0x57f   : > { %p2460_p2 = pnand %p2463_p1, %p2651_p6 }
 0x581   : > { %2555 = dma.done.wait (!%p2460_p2), %s2297_s10, 256  }
 0x582   : > { %2557 = vsyncadd (!%p2460_p2), %s2297_s10, 4294967040  ;;  %p14_p3 = scmp.ge.s32.totalorder %s2634_s21, 4   ;;  %s3088_s15 = smov %s2564_s16 }
 0x583   : > { %s3089_s16 = smov %s2568_s17  ;;  %s3090_s17 = smov %s2645_s24 }
 0x584   : > { %s3091_s18 = smov %s2634_s21  ;;  %16 = sbr.rel (!%p14_p3) target bundleno = 3 (0x3), region = 95 }
 0x58b   :  { %2302 = vsyncpa [#allocation4], 1 }
 0x58c   :  { %2304 = vsyncpa [#allocation4 + $0x1], 1 }

</bundles_post_ra>
